<compile_context>
chip_gen: v7x
topology: tpu7x:2x2x1
jax: 0.10.0
libtpu: 0.0.40
codegen_flags: <defaults>
</compile_context>

<pallas_src>
import functools

import jax
import jax.numpy as jnp
from jax import lax
from jax.experimental import pallas as pl
from jax.experimental.pallas import tpu as pltpu


def head_kernel(x_ref, wq_ref, wk_ref, wv_ref, o_ref, *,
                scale, heads_per_group, sub_c, compute_dtype, exact_recip):
    """One grid step = one batch element x one 128-lane-aligned group of heads.

    x_ref : (1, T, C)   VMEM block, already in compute_dtype (pre-cast in wrapper)
    w*_ref: (C, GW)     VMEM blocks of the pre-transposed (C_in, C_out) weights,
                        already in compute_dtype; GW = heads_per_group * sub_c
    o_ref : (1, T, GW)  VMEM block (lane-dense, 128-multiple last dim)
    """
    f32 = jnp.float32
    x = x_ref[0]                                              # (T, C), compute_dtype

    # Projections for this head group: plain (M,K)x(K,N) MXU matmuls, f32 accumulation.
    # The 1/sqrt(C) score scale is folded into q once (T*GW muls instead of H*T*T).
    q = jnp.dot(x, wq_ref[...], preferred_element_type=f32) * scale   # (T, GW) f32
    k = jnp.dot(x, wk_ref[...], preferred_element_type=f32)           # (T, GW) f32
    v = jnp.dot(x, wv_ref[...], preferred_element_type=f32)           # (T, GW) f32

    t = q.shape[0]
    # Causal mask (== tril[:T, :T]); diagonal always unmasked so no all--inf rows.
    row = lax.broadcasted_iota(jnp.int32, (t, t), 0)
    col = lax.broadcasted_iota(jnp.int32, (t, t), 1)
    causal = col <= row

    nt = (((1,), (1,)), ((), ()))        # contract last dims of both operands: A @ B^T
    ctx_cols = []
    for h in range(heads_per_group):     # static unroll; heads_per_group is small
        sl = slice(h * sub_c, (h + 1) * sub_c)
        # Cast only the small per-head slices right before the MXU ops -- no full-width
        # bf16 copies of q/k/v round-trip VMEM.
        qh = q[:, sl].astype(compute_dtype)                   # (T, sub_c)
        kh = k[:, sl].astype(compute_dtype)
        vh = v[:, sl].astype(compute_dtype)

        s = lax.dot_general(qh, kh, nt, preferred_element_type=f32)   # (T, T) f32
        s = jnp.where(causal, s, -jnp.inf)

        # Softmax kept in f32 (portable incl. v5e; bf16-exp only if EUP proves binding).
        m = jnp.max(s, axis=-1, keepdims=True)
        p = jnp.exp(s - m)
        l = jnp.sum(p, axis=-1, keepdims=True)
        # TODO(synk): nn.Dropout(0.1) on the attention probabilities is training-time
        # randomness; implemented as identity (eval-mode semantics).

        ctx = jnp.dot(p.astype(compute_dtype), vh, preferred_element_type=f32)
        inv_l = pl.reciprocal(l, approx=not exact_recip)      # EUP slot when approximate
        ctx_cols.append(ctx * inv_l)

    # Single lane-dense (T, GW) store for this head group.
    o_ref[0] = jnp.concatenate(ctx_cols, axis=-1).astype(o_ref.dtype)


def _pick_heads_per_group(num_heads, sub_c, batch):
    # Small batch: split heads into the smallest 128-lane-aligned groups -> more parallel
    # grid steps (v7x megacore sharding + DMA/compute overlap even when B is 1-2 or odd).
    # Larger batch: keep all heads in one step (bigger per-step MXU work, amortizes the
    # ~0.35 us per-step overhead).
    if batch >= 4:
        return num_heads
    for hpg in range(1, num_heads + 1):
        if num_heads % hpg == 0 and (hpg * sub_c) % 128 == 0:
            return hpg
    return num_heads


def head_forward(x, wq, wk, wv, num_heads, *,
                 compute_dtype=jnp.bfloat16, out_dtype=None, heads_per_group=None):
    """Pallas forward pass matching the PyTorch Head module (eval mode)."""
    B, T, C = x.shape
    head_size = wq.shape[0]
    assert head_size == C, "reshape in Head.forward requires head_size == C"
    assert C % num_heads == 0
    sub_c = C // num_heads
    scale = 1.0 / (C ** 0.5)   # module scales by sqrt(C) (full channel dim) -- intentional

    if out_dtype is None:
        out_dtype = compute_dtype          # bf16 output halves writeback HBM traffic
    if heads_per_group is None:
        heads_per_group = _pick_heads_per_group(num_heads, sub_c, B)
    assert num_heads % heads_per_group == 0
    n_groups = num_heads // heads_per_group
    gw = heads_per_group * sub_c           # group width (output lanes per step)

    exact_recip = jnp.dtype(compute_dtype) == jnp.dtype(jnp.float32)

    # One-time dtype/layout plumbing outside the kernel (per review):
    #  * weights transposed to (C_in, C_out): standard contraction, no in-kernel transpose;
    #  * x and weights pre-cast to compute_dtype: no per-step casts/spills, half the HBM
    #    read bytes when compute_dtype is bf16.
    x_c = x.astype(compute_dtype)
    wq_t = jnp.transpose(wq).astype(compute_dtype)
    wk_t = jnp.transpose(wk).astype(compute_dtype)
    wv_t = jnp.transpose(wv).astype(compute_dtype)

    kernel = functools.partial(
        head_kernel, scale=scale, heads_per_group=heads_per_group, sub_c=sub_c,
        compute_dtype=compute_dtype, exact_recip=exact_recip)

    cost = pl.CostEstimate(
        flops=6 * B * T * C * head_size + 4 * B * num_heads * T * T * sub_c,
        transcendentals=B * num_heads * T * T,
        bytes_accessed=(B * T * C + 3 * C * head_size) * jnp.dtype(compute_dtype).itemsize
                       + B * T * C * jnp.dtype(out_dtype).itemsize,
    )

    # TODO(synk): for large B, block 2-4 batch elements per grid step ((BB, T, C) blocks)
    # to amortize per-step overhead further; for T >> 1-2K add a query-tile axis with an
    # online-softmax KV loop. Unnecessary at this module's block_size=256.
    return pl.pallas_call(
        kernel,
        out_shape=jax.ShapeDtypeStruct((B, T, C), out_dtype),
        grid_spec=pltpu.PrefetchScalarGridSpec(
            num_scalar_prefetch=0,
            grid=(B, n_groups),
            in_specs=[
                pl.BlockSpec((1, T, C), lambda b, g: (b, 0, 0)),   # x slab (shared over g)
                pl.BlockSpec((C, gw), lambda b, g: (0, g)),        # Wq^T columns for group g
                pl.BlockSpec((C, gw), lambda b, g: (0, g)),        # Wk^T
                pl.BlockSpec((C, gw), lambda b, g: (0, g)),        # Wv^T
            ],
            out_specs=pl.BlockSpec((1, T, gw), lambda b, g: (b, 0, g)),
        ),
        compiler_params=pltpu.CompilerParams(
            # Both axes independent -> shards across v7x's two TensorCores even at small B.
            dimension_semantics=("parallel", "parallel"),
            vmem_limit_bytes=32 * 1024 * 1024,
        ),
        cost_estimate=cost,
    )(x_c, wq_t, wk_t, wv_t)


def head_reference(x, wq, wk, wv, num_heads):
    """Plain-JAX reference mirroring the PyTorch forward (eval mode), high precision."""
    B, T, C = x.shape
    sub_c = C // num_heads
    hi = jax.lax.Precision.HIGHEST
    q = jnp.einsum("btc,oc->bto", x, wq, precision=hi)
    k = jnp.einsum("btc,oc->bto", x, wk, precision=hi)
    v = jnp.einsum("btc,oc->bto", x, wv, precision=hi)
    qh = q.reshape(B, T, num_heads, sub_c).transpose(0, 2, 1, 3)
    kh = k.reshape(B, T, num_heads, sub_c).transpose(0, 2, 1, 3)
    vh = v.reshape(B, T, num_heads, sub_c).transpose(0, 2, 1, 3)
    s = jnp.einsum("bhqd,bhkd->bhqk", qh, kh, precision=hi) / (C ** 0.5)
    mask = jnp.tril(jnp.ones((T, T), dtype=bool))
    s = jnp.where(mask, s, -jnp.inf)
    p = jax.nn.softmax(s, axis=-1)
    ctx = jnp.einsum("bhqk,bhkd->bhqd", p, vh, precision=hi)
    return ctx.transpose(0, 2, 1, 3).reshape(B, T, C)


if __name__ == "__main__":
    # Shapes consistent with the module: nn.Linear(384, head_size) => C = 384, and the
    # in-forward reshape requires head_size == C; block_size = 256 bounds T (small T here).
    B, T, C = 2, 64, 384
    num_heads = 6
    head_size = C

    key = jax.random.PRNGKey(0)
    kx, kq, kk, kv = jax.random.split(key, 4)

    x = jax.random.normal(kx, (B, T, C), dtype=jnp.float32)
    # nn.Linear default (kaiming-uniform-like) init, deterministic.
    bound = 1.0 / (C ** 0.5)
    wq = jax.random.uniform(kq, (head_size, C), jnp.float32, -bound, bound)
    wk = jax.random.uniform(kk, (head_size, C), jnp.float32, -bound, bound)
    wv = jax.random.uniform(kv, (head_size, C), jnp.float32, -bound, bound)

    ref = head_reference(x, wq, wk, wv, num_heads)

    # Full-precision path (f32 operands/output, exact reciprocal): tight check.
    out_f32 = jax.block_until_ready(
        head_forward(x, wq, wk, wv, num_heads,
                     compute_dtype=jnp.float32, out_dtype=jnp.float32))
    assert out_f32.shape == (B, T, C) and out_f32.dtype == jnp.float32
    assert jnp.allclose(out_f32, ref, atol=2e-2, rtol=2e-2), "f32 kernel mismatch"

    # Default fast path: bf16 MXU operands + bf16 output, f32 accumulation & softmax.
    out_bf16 = jax.block_until_ready(head_forward(x, wq, wk, wv, num_heads))
    assert out_bf16.shape == (B, T, C) and out_bf16.dtype == jnp.bfloat16
    assert jnp.allclose(out_bf16.astype(jnp.float32), ref, atol=5e-2, rtol=5e-2), \
        "bf16 kernel mismatch"

    print("KERNEL_OK")
</pallas_src>

<mosaic_0001>
module attributes {stable_mosaic.version = 11 : i64} {
  func.func @head_kernel(%arg0: i32, %arg1: i32, %arg2: memref<1x64x384xf32, #tpu.memory_space<vmem>>, %arg3: memref<384x128xf32, #tpu.memory_space<vmem>>, %arg4: memref<384x128xf32, #tpu.memory_space<vmem>>, %arg5: memref<384x128xf32, #tpu.memory_space<vmem>>, %arg6: memref<1x64x128xf32, #tpu.memory_space<vmem>>) attributes {dimension_semantics = [#tpu.dimension_semantics<parallel>, #tpu.dimension_semantics<parallel>], iteration_bounds = array<i64: 2, 3>, scalar_prefetch = 0 : i64, scratch_operands = 0 : i64, tpu.core_type = #tpu.core_type<tc>, window_params = [{transform_indices = @transform_0, window_bounds = array<i64: 1, 64, 384>}, {transform_indices = @transform_1, window_bounds = array<i64: 384, 128>}, {transform_indices = @transform_2, window_bounds = array<i64: 384, 128>}, {transform_indices = @transform_3, window_bounds = array<i64: 384, 128>}, {transform_indices = @transform_4, window_bounds = array<i64: 1, 64, 128>}]} {
    %c0 = arith.constant 0 : index
    %c0_0 = arith.constant 0 : index
    %c0_1 = arith.constant 0 : index
    %0 = vector.load %arg2[%c0, %c0_0, %c0_1] : memref<1x64x384xf32, #tpu.memory_space<vmem>>, vector<1x64x384xf32>
    %1 = vector.shape_cast %0 : vector<1x64x384xf32> to vector<64x384xf32>
    %c0_2 = arith.constant 0 : index
    %c0_3 = arith.constant 0 : index
    %2 = vector.load %arg3[%c0_2, %c0_3] : memref<384x128xf32, #tpu.memory_space<vmem>>, vector<384x128xf32>
    %cst = arith.constant dense<0.000000e+00> : vector<64x128xf32>
    %3 = tpu.matmul %1, %2, %cst {dimension_numbers = #tpu.dot_dimension_numbers<[1], [0], [0], [1], [0, 0, 1, 1], [], []>} : vector<64x384xf32>, vector<384x128xf32>, vector<64x128xf32> -> vector<64x128xf32>
    %cst_4 = arith.constant 0.0510310382 : f32
    %4 = vector.broadcast %cst_4 : f32 to vector<64x128xf32>
    %5 = arith.mulf %3, %4 : vector<64x128xf32>
    %c0_5 = arith.constant 0 : index
    %c0_6 = arith.constant 0 : index
    %6 = vector.load %arg4[%c0_5, %c0_6] : memref<384x128xf32, #tpu.memory_space<vmem>>, vector<384x128xf32>
    %cst_7 = arith.constant dense<0.000000e+00> : vector<64x128xf32>
    %7 = tpu.matmul %1, %6, %cst_7 {dimension_numbers = #tpu.dot_dimension_numbers<[1], [0], [0], [1], [0, 0, 1, 1], [], []>} : vector<64x384xf32>, vector<384x128xf32>, vector<64x128xf32> -> vector<64x128xf32>
    %c0_8 = arith.constant 0 : index
    %c0_9 = arith.constant 0 : index
    %8 = vector.load %arg5[%c0_8, %c0_9] : memref<384x128xf32, #tpu.memory_space<vmem>>, vector<384x128xf32>
    %cst_10 = arith.constant dense<0.000000e+00> : vector<64x128xf32>
    %9 = tpu.matmul %1, %8, %cst_10 {dimension_numbers = #tpu.dot_dimension_numbers<[1], [0], [0], [1], [0, 0, 1, 1], [], []>} : vector<64x384xf32>, vector<384x128xf32>, vector<64x128xf32> -> vector<64x128xf32>
    %10 = tpu.iota {dimensions = array<i32: 0>} : vector<64x64xi32>
    %11 = tpu.iota {dimensions = array<i32: 1>} : vector<64x64xi32>
    %12 = arith.cmpi sle, %11, %10 : vector<64x64xi32>
    %13 = vector.extract_strided_slice %5 {offsets = [0, 0], sizes = [64, 64], strides = [1, 1]} : vector<64x128xf32> to vector<64x64xf32>
    %14 = vector.extract_strided_slice %7 {offsets = [0, 0], sizes = [64, 64], strides = [1, 1]} : vector<64x128xf32> to vector<64x64xf32>
    %15 = vector.extract_strided_slice %9 {offsets = [0, 0], sizes = [64, 64], strides = [1, 1]} : vector<64x128xf32> to vector<64x64xf32>
    %cst_11 = arith.constant dense<0.000000e+00> : vector<64x64xf32>
    %16 = tpu.matmul %13, %14, %cst_11 {dimension_numbers = #tpu.dot_dimension_numbers<[1], [1], [0], [0], [0, 0, 1, 0], [], []>} : vector<64x64xf32>, vector<64x64xf32>, vector<64x64xf32> -> vector<64x64xf32>
    %cst_12 = arith.constant 0xFF800000 : f32
    %17 = vector.broadcast %cst_12 : f32 to vector<64x64xf32>
    %18 = arith.select %12, %16, %17 : vector<64x64xi1>, vector<64x64xf32>
    %cst_13 = arith.constant dense<0xFF800000> : vector<64xf32>
    %19 = vector.multi_reduction <maximumf>, %18, %cst_13 [1] : vector<64x64xf32> to vector<64xf32>
    %20 = vector.shape_cast %19 : vector<64xf32> to vector<64x1xf32>
    %21 = vector.broadcast %20 : vector<64x1xf32> to vector<64x64xf32>
    %22 = arith.subf %18, %21 : vector<64x64xf32>
    %23 = math.exp %22 : vector<64x64xf32>
    %cst_14 = arith.constant dense<0.000000e+00> : vector<64xf32>
    %24 = vector.multi_reduction <add>, %23, %cst_14 [1] : vector<64x64xf32> to vector<64xf32>
    %25 = vector.shape_cast %24 : vector<64xf32> to vector<64x1xf32>
    %cst_15 = arith.constant dense<0.000000e+00> : vector<64x64xf32>
    %26 = tpu.matmul %23, %15, %cst_15 {dimension_numbers = #tpu.dot_dimension_numbers<[1], [0], [0], [1], [0, 0, 1, 1], [], []>} : vector<64x64xf32>, vector<64x64xf32>, vector<64x64xf32> -> vector<64x64xf32>
    %27 = tpu.reciprocal %25 : vector<64x1xf32> -> vector<64x1xf32>
    %28 = vector.broadcast %27 : vector<64x1xf32> to vector<64x64xf32>
    %29 = arith.mulf %26, %28 : vector<64x64xf32>
    %30 = vector.extract_strided_slice %5 {offsets = [0, 64], sizes = [64, 64], strides = [1, 1]} : vector<64x128xf32> to vector<64x64xf32>
    %31 = vector.extract_strided_slice %7 {offsets = [0, 64], sizes = [64, 64], strides = [1, 1]} : vector<64x128xf32> to vector<64x64xf32>
    %32 = vector.extract_strided_slice %9 {offsets = [0, 64], sizes = [64, 64], strides = [1, 1]} : vector<64x128xf32> to vector<64x64xf32>
    %cst_16 = arith.constant dense<0.000000e+00> : vector<64x64xf32>
    %33 = tpu.matmul %30, %31, %cst_16 {dimension_numbers = #tpu.dot_dimension_numbers<[1], [1], [0], [0], [0, 0, 1, 0], [], []>} : vector<64x64xf32>, vector<64x64xf32>, vector<64x64xf32> -> vector<64x64xf32>
    %cst_17 = arith.constant 0xFF800000 : f32
    %34 = vector.broadcast %cst_17 : f32 to vector<64x64xf32>
    %35 = arith.select %12, %33, %34 : vector<64x64xi1>, vector<64x64xf32>
    %cst_18 = arith.constant dense<0xFF800000> : vector<64xf32>
    %36 = vector.multi_reduction <maximumf>, %35, %cst_18 [1] : vector<64x64xf32> to vector<64xf32>
    %37 = vector.shape_cast %36 : vector<64xf32> to vector<64x1xf32>
    %38 = vector.broadcast %37 : vector<64x1xf32> to vector<64x64xf32>
    %39 = arith.subf %35, %38 : vector<64x64xf32>
    %40 = math.exp %39 : vector<64x64xf32>
    %cst_19 = arith.constant dense<0.000000e+00> : vector<64xf32>
    %41 = vector.multi_reduction <add>, %40, %cst_19 [1] : vector<64x64xf32> to vector<64xf32>
    %42 = vector.shape_cast %41 : vector<64xf32> to vector<64x1xf32>
    %cst_20 = arith.constant dense<0.000000e+00> : vector<64x64xf32>
    %43 = tpu.matmul %40, %32, %cst_20 {dimension_numbers = #tpu.dot_dimension_numbers<[1], [0], [0], [1], [0, 0, 1, 1], [], []>} : vector<64x64xf32>, vector<64x64xf32>, vector<64x64xf32> -> vector<64x64xf32>
    %44 = tpu.reciprocal %42 : vector<64x1xf32> -> vector<64x1xf32>
    %45 = vector.broadcast %44 : vector<64x1xf32> to vector<64x64xf32>
    %46 = arith.mulf %43, %45 : vector<64x64xf32>
    %47 = tpu.concatenate %29, %46 in 1 : vector<64x64xf32>, vector<64x64xf32> -> vector<64x128xf32>
    %c0_21 = arith.constant 0 : index
    %c0_22 = arith.constant 0 : index
    %c0_23 = arith.constant 0 : index
    %48 = vector.load %arg6[%c0_21, %c0_22, %c0_23] : memref<1x64x128xf32, #tpu.memory_space<vmem>>, vector<1x64x128xf32>
    %49 = vector.shape_cast %48 : vector<1x64x128xf32> to vector<64x128xf32>
    %50 = vector.shape_cast %47 : vector<64x128xf32> to vector<1x64x128xf32>
    tpu.vector_store %arg6[%c0_21, %c0_22, %c0_23], %50 {strides = array<i32>} : memref<1x64x128xf32, #tpu.memory_space<vmem>>, vector<1x64x128xf32>,
    return
  }
  func.func @transform_0(%arg0: i32, %arg1: i32) -> (i32, i32, i32) {
    %c0_i32 = arith.constant 0 : i32
    %c0_i32_0 = arith.constant 0 : i32
    %c0_i32_1 = arith.constant 0 : i32
    return %arg0, %c0_i32, %c0_i32_0 : i32, i32, i32
  }
  func.func @transform_1(%arg0: i32, %arg1: i32) -> (i32, i32) {
    %c0_i32 = arith.constant 0 : i32
    %c0_i32_0 = arith.constant 0 : i32
    return %c0_i32, %arg1 : i32, i32
  }
  func.func @transform_2(%arg0: i32, %arg1: i32) -> (i32, i32) {
    %c0_i32 = arith.constant 0 : i32
    %c0_i32_0 = arith.constant 0 : i32
    return %c0_i32, %arg1 : i32, i32
  }
  func.func @transform_3(%arg0: i32, %arg1: i32) -> (i32, i32) {
    %c0_i32 = arith.constant 0 : i32
    %c0_i32_0 = arith.constant 0 : i32
    return %c0_i32, %arg1 : i32, i32
  }
  func.func @transform_4(%arg0: i32, %arg1: i32) -> (i32, i32, i32) {
    %c0_i32 = arith.constant 0 : i32
    %c0_i32_0 = arith.constant 0 : i32
    return %arg0, %c0_i32, %arg1 : i32, i32, i32
  }
}

</mosaic_0001>

<bundles_post_ra>
// kernel: tpu_custom_call.1
= control target key start
LH: loop header
LB: loop body
LE: loop exit
PB: predicated region body
PF: predicated region fallthrough
CT: control target
= control target key end

     0   :  { %s4804_s0 = inlined_call_operand.hbm [shape: f32[2,64,384], index: 0, kind: input, shape index: {}]   ;;  %s4805_s1 = inlined_call_operand.hbm [shape: f32[384,384], index: 1, kind: input, shape index: {}]   ;;  %s4806_s2 = inlined_call_operand.hbm [shape: f32[384,384], index: 2, kind: input, shape index: {}]   ;;  %s4807_s3 = inlined_call_operand.hbm [shape: f32[384,384], index: 3, kind: input, shape index: {}]   ;;  %s4808_s4 = inlined_call_operand.hbm [shape: f32[2,64,384], index: 4, kind: output, shape index: {}]  }
   0x1   :  { %4835 = sst [smem:[#allocation28_spill]] %s4805_s1 }
   0x2   :  { %4836 = sst [smem:[#allocation29_spill]] %s4808_s4 }
   0x3   :  { %9 = vsyncpa [#allocation3], 0 }
   0x4   :  { %11 = vsyncpa [#allocation3 + $0x1], 0 }
   0x5   :  { %12 = vsyncpa [#allocation6], 0 }
   0x6   :  { %14 = vsyncpa [#allocation6 + $0x1], 0 }
   0x7   :  { %15 = vsyncpa [#allocation9], 0 }
   0x8   :  { %17 = vsyncpa [#allocation9 + $0x1], 0 }
   0x9   :  { %18 = vsyncpa [#allocation4], 0 }
   0xa   :  { %20 = vsyncpa [#allocation4 + $0x1], 0  ;;  %s3646_s15 = smov 0   ;;  %s3648_s16 = smov 0  }
   0xb   :  { %s3650_s17 = smov 0   ;;  %s3652_s18 = smov 0  }
   0xc   :  { %s3654_s19 = smov 0   ;;  %s3656_s20 = smov 0  }
   0xd   :  { %s3658_s21 = smov 0   ;;  %s3660_s22 = smov 0  }
   0xe   :  { %s3662_s23 = smov 0   ;;  %s3664_s24 = smov 0  }
   0xf   :  { %s3666_s25 = smov 0   ;;  %s3668_s26 = smov 0  }
  0x10   :  { %s3670_s27 = smov 0   ;;  %s3672_s28 = smov 0  }
  0x11 LB: > { %4837 = sst [smem:[#allocation15_spill]] %s3570_s19  ;;  %s35_s29 = sadd.s32 1, %s3598_s26  ;;  %s3606_s28 = sphi %s3672_s28, %s26_s28   ;;  %s3602_s27 = sphi %s3670_s27, %s4891_s27   ;;  %s3598_s26 = sphi %s3668_s26, %s4890_s26   ;;  %s3594_s25 = sphi %s3666_s25, %s4889_s25   ;;  %s3590_s24 = sphi %s3664_s24, %s4888_s24   ;;  %s3586_s23 = sphi %s3662_s23, %s4887_s23   ;;  %s3582_s22 = sphi %s3660_s22, %s4899_s22   ;;  %s3578_s21 = sphi %s3658_s21, %s4898_s21   ;;  %s3574_s20 = sphi %s3656_s20, %s4897_s20   ;;  %s3570_s19 = sphi %s3654_s19, %s4896_s19   ;;  %s3566_s18 = sphi %s3652_s18, %s4895_s18   ;;  %s3562_s17 = sphi %s3650_s17, %s4894_s17   ;;  %s3558_s16 = sphi %s3648_s16, %s4893_s16   ;;  %s3554_s15 = sphi %s3646_s15, %s4892_s15  }
  0x12   : > { %4838 = sst [smem:[#allocation16_spill]] %s3586_s23  ;;  %p4814_p0 = scmp.eq.s32.totalorder %s3606_s28, 0 }
  0x13   : > { %4839 = sst [smem:[#allocation17_spill]] %s3590_s24  ;;  %p3718_p1 = scmp.ge.s32.totalorder %s35_s29, 3 }
  0x14   : > { %4840 = sst [smem:[#allocation18_spill]] %s3594_s25  ;;  %s71_s5 = sadd.s32 1, %s3574_s20 }
  0x15   : > { %4841 = sst [smem:[#allocation19_spill]] %s3598_s26  ;;  %p78_p2 = scmp.ne.s32.totalorder %s3574_s20, %s3570_s19 }
  0x16   : > { %4842 = sst [smem:[#allocation20_spill]] %s3602_s27  ;;  %s4901_s29 = smov (%p3718_p1, %s35_s29), 0 }
  0x17   : > { %s4843_s30 = scalar_select %p3718_p1, 1, 0 }
  0x18   : > { %4844 = sst [smem:[#allocation21_spill]] %s4901_s29  ;;  %p80_p3 = por %p78_p2, %p4814_p0 }
  0x19   : > { %p4813_p4 = scmp.lt.s32.totalorder %s3606_s28, 6  ;;  %s3734_s6 = ssub.s32 %s3598_s26, %s4901_s29 }
  0x1a   : > { %p69_p5 = scmp.eq.s32.totalorder %s3734_s6, 0  ;;  %s209_s7 = sand.u32 1, %s3606_s28  }
  0x1b   : > { %s4809_s8 = sand.u32 1, %s3574_s20   ;;  %s3747_s11 = sshll.u32 %s3598_s26, 7 }
  0x1c   : > { %s3740_s9 = scalar_select %p69_p5, %s3574_s20, %s71_s5  }
  0x1d   : > { %s3744_s10 = smul.u32 384, %s4809_s8  ;;  %s4846_s1 = sld [smem:[#allocation28_spill]] }
  0x1e   : > { %4845 = sst [smem:[#allocation22_spill]] %s3740_s9  ;;  %p3757_p6 = pnand %p4813_p4, %p80_p3 }
  0x1f   : > { %s213_s8 = scalar_lea.vmem [#allocation5], %s3744_s10  ;;  %s3764_s26 = scalar_lea.sflag [#allocation6], %s209_s7 }
  0x20   : > { %s4847_s5 = scalar_select %p3757_p6, 1, 0 }
  0x21   : > { %s219_s29 = sshll.u32 %s213_s8, 4  ;;  %p3770_p8 = pneg %p3757_p6  ;;  %s3762_s29 = int_to_ptr.vmem [resolvable:$true] %s219_s29 }
  0x23   : > { %s3753_s14 = scalar_lea.hbm %s4846_s1, %s3747_s11  ;;  %s3337_s24 = scalar_lea.hbm %s4846_s1, 18432 }
  0x24   : > { %s3332_s9 = scalar_lea.hbm %s3753_s14, 6144  ;;  %p3338_p11 = scmp.lt.u32.totalorder %s3753_s14, %s4846_s1 }
  0x25   : > { %p3333_p7 = scmp.ne.s32.totalorder %s3753_s14, %s3332_s9  ;;  %p3339_p12 = scmp.lt.u32.totalorder %s3337_s24, %s3332_s9 }
  0x26   : > { %p3341_p2 = scmp.lt.u32.totalorder %s3332_s9, %s3753_s14 }
  0x27   : > { %p3335_p9 = pnand %p3770_p8, %p3333_p7  ;;  %p3340_p13 = por %p3339_p12, %p3338_p11 }
  0x29   : > { %p3336_p10 = pneg %p3335_p9  ;;  %p3342_p3 = por %p3341_p2, %p3340_p13 }
  0x2b   : > { %p3343_p5 = pnand %p3342_p3, %p3336_p10 }
  0x2d   : > { %3346 = shalt.err (!%p3343_p5)
}
  0x2e   : > { %s3347_s7 = scalar_lea.vmem %s3762_s29, 6144  ;;  %s3608_s4 = smov [#allocation5]  }
  0x2f   : > { %p3348_p7 = scmp.ne.s32.totalorder %s3762_s29, %s3347_s7  ;;  %s3352_s13 = sshll.u32 %s3608_s4, 4  ;;  %s3353_s13 = int_to_ptr.vmem [resolvable:$false] %s3352_s13 }
  0x30   : > { %s3354_s25 = scalar_lea.vmem %s3353_s13, 12288  ;;  %p3355_p0 = scmp.lt.s32.totalorder %s3762_s29, %s3353_s13 }
  0x31   : > { %p3350_p9 = pnand %p3348_p7, %p3770_p8  ;;  %p3356_p1 = scmp.lt.s32.totalorder %s3354_s25, %s3347_s7 }
  0x33   : > { %p3351_p4 = pneg %p3350_p9  ;;  %p3357_p11 = por %p3356_p1, %p3355_p0 }
  0x35   : > { %p3358_p12 = pnand %p3357_p11, %p3351_p4 }
  0x37   : > { %3361 = shalt.err (!%p3358_p12)
}
  0x38   : > { %s4820_s24 = smov 384   ;;  %s4816_s9 = smov 128  }
  0x39   : > { %s4818_s8 = smov 8   ;;  %p2197_p0 = scmp.ge.s32.totalorder %s3606_s28, 1 }
  0x3a   : > { %3095 = dma.hbm_to_vmem [thread:$0]  (!%p3757_p6), %s3753_s14, 6144, %s3762_s29, %s3764_s26, %s4820_s24, %s4816_s9, %s4818_s8  }
  0x3b   : > { %p267_p1 = scmp.lt.s32.totalorder %s3606_s28, 7  ;;  %s3804_s4 = sadd.s32 4294967295, %s3606_s28  }
  0x3c   : > { %s2190_s13 = sadd.s32 4294967294, %s3606_s28   ;;  %s38_s25 = sadd.s32 1, %s3602_s27 }
  0x3d   : > { %p3799_p4 = pnand %p2197_p0, %p267_p1  ;;  %p4850_p10 = scmp.ne.s32.totalorder %s4843_s30, 0 }
  0x3e   : > { %s45_s29 = sadd.s32 1, %s3586_s23  ;;  %p52_p13 = scmp.ne.s32.totalorder %s3586_s23, %s3582_s22 }
  0x3f   : > { %s4849_s7 = scalar_select %p3799_p4, 1, 0 }
  0x40   : > { %s4903_s25 = smov (!%p4850_p10, %s38_s25), %s3602_s27  ;;  %p58_p3 = scmp.ne.s32.totalorder %s3582_s22, %s3578_s21 }
  0x41   : > { %p40_p2 = scmp.ge.s32.totalorder %s4903_s25, 2  ;;  %p4851_p5 = scmp.eq.s32.totalorder %s3606_s28, 0 }
  0x42   : > { %p59_p9 = scmp.eq.s32.totalorder %s3804_s4, 0  ;;  %p84_p12 = scmp.ne.s32.totalorder %s3570_s19, %s3566_s18 }
  0x43   : > { %p3818_p7 = por %p4851_p5, %p52_p13  ;;  %s4905_s25 = smov (%p40_p2, %s4903_s25), 0 }
  0x44   : > { %4853 = sst [smem:[#allocation23_spill]] %s4905_s25  ;;  %p3825_p11 = por %p59_p9, %p58_p3 }
  0x45   : > { %s42_s9 = ssub.s32 %s3602_s27, %s4905_s25  ;;  %s151_s8 = sadd.s32 1, %s3562_s17 }
  0x46   : > { %s4854_s30 = scalar_select %p3825_p11, 1, 0 }
  0x47   : > { %p43_p0 = scmp.eq.s32.totalorder %s42_s9, 0  ;;  %p3834_p1 = por %p84_p12, %p59_p9 }
  0x48   : > { %4855 = sst [smem:[#allocation24_spill]] %s4854_s30  ;;  %s148_s24 = sor.u32 %s3734_s6, %s42_s9 }
  0x49   : > { %s4856_s21 = scalar_select %p3834_p1, 1, 0 }
  0x4a   : > { %p161_p10 = scmp.ne.s32.totalorder %s3562_s17, %s3558_s16  ;;  %p149_p13 = scmp.eq.s32.totalorder %s148_s24, 0 }
  0x4b   : > { %4857 = sst [smem:[#allocation25_spill]] %s4856_s21  ;;  %p162_p2 = scmp.eq.s32.totalorder %s3804_s4, 5 }
  0x4c   : > { %s3842_s1 = scalar_select %p43_p0, %s3586_s23, %s45_s29  }
  0x4d   : > { %p167_p3 = scmp.ne.s32.totalorder %s3558_s16, %s3554_s15  ;;  %p168_p5 = scmp.eq.s32.totalorder %s2190_s13, 5 }
  0x4e   : > { %4858 = sst [smem:[#allocation26_spill]] %s3842_s1  ;;  %p3850_p11 = por %p162_p2, %p161_p10 }
  0x4f   : > { %s3848_s30 = scalar_select %p149_p13, %s3562_s17, %s151_s8  }
  0x50   : > { %s4860_s18 = scalar_select %p3850_p11, 1, 0 }
  0x51   : > { %4859 = sst [smem:[#allocation27_spill]] %s3848_s30  ;;  %p3854_p4 = por %p168_p5, %p167_p3 }
  0x52   : > { %s188_s19 = sand.u32 1, %s3586_s23   ;;  %s3072_s21 = smul.u32 3072, %s3602_s27 }
  0x53   : > { %s4861_s25 = scalar_select %p3854_p4, 1, 0 }
  0x54   : > { %s3071_s6 = smul.u32 192, %s188_s19  ;;  %s3863_s24 = scalar_lea.hbm %s4804_s0, %s3072_s21 }
  0x55   : > { %p4862_p9 = scmp.lt.s32.totalorder %s3606_s28, 6  ;;  %s3875_s1 = scalar_lea.sflag [#allocation3], %s188_s19 }
  0x56   : > { %s192_s13 = scalar_lea.vmem [#allocation2], %s3071_s6  ;;  %s3362_s21 = scalar_lea.hbm %s3863_s24, 3072 }
  0x57   : > { %p3869_p12 = pnand %p4862_p9, %p3818_p7  ;;  %s199_s27 = sshll.u32 %s192_s13, 4  ;;  %s3873_s27 = int_to_ptr.vmem [resolvable:$true] %s199_s27 }
  0x58   : > { %p3363_p0 = scmp.ne.s32.totalorder %s3863_s24, %s3362_s21  ;;  %s3367_s29 = scalar_lea.hbm %s4804_s0, 6144 }
  0x59   : > { %p3364_p10 = pneg %p3869_p12  ;;  %p3368_p7 = scmp.lt.u32.totalorder %s3863_s24, %s4804_s0 }
  0x5a   : > { %p3369_p3 = scmp.lt.u32.totalorder %s3367_s29, %s3362_s21  ;;  %p3371_p9 = scmp.lt.u32.totalorder %s3362_s21, %s3863_s24 }
  0x5b   : > { %p3365_p13 = pnand %p3364_p10, %p3363_p0 }
  0x5c   : > { %p3370_p5 = por %p3369_p3, %p3368_p7 }
  0x5d   : > { %p3366_p2 = pneg %p3365_p13 }
  0x5e   : > { %p3372_p4 = por %p3371_p9, %p3370_p5 }
  0x60   : > { %p3373_p11 = pnand %p3372_p4, %p3366_p2 }
  0x62   : > { %3376 = shalt.err (!%p3373_p11)
}
  0x63   : > { %s3377_s19 = scalar_lea.vmem %s3873_s27, 3072  ;;  %s3612_s6 = smov [#allocation2]  }
  0x64   : > { %p3378_p0 = scmp.ne.s32.totalorder %s3873_s27, %s3377_s19  ;;  %s3382_s13 = sshll.u32 %s3612_s6, 4  ;;  %s3383_s13 = int_to_ptr.vmem [resolvable:$false] %s3382_s13 }
  0x65   : > { %s3384_s23 = scalar_lea.vmem %s3383_s13, 6144  ;;  %p3385_p6 = scmp.lt.s32.totalorder %s3873_s27, %s3383_s13 }
  0x66   : > { %p3380_p13 = pnand %p3378_p0, %p3364_p10  ;;  %p3386_p7 = scmp.lt.s32.totalorder %s3384_s23, %s3377_s19 }
  0x68   : > { %p3381_p1 = pneg %p3380_p13  ;;  %p3387_p3 = por %p3386_p7, %p3385_p6 }
  0x6a   : > { %p3388_p5 = pnand %p3387_p3, %p3381_p1 }
  0x6c   : > { %3391 = shalt.err (!%p3388_p5)
}
  0x6d   : > { %s3613_s30 = smov 24   ;;  %s4864_s21 = smov 384  }
  0x6e   : > { %3092 = dma.hbm_to_vmem [thread:$0]  (!%p3869_p12), %s3863_s24, 3072, %s3873_s27, %s3875_s1, %s4864_s21, %s4864_s21, %s3613_s30  }
  0x6f   : > { %s3909_s29 = scalar_lea.hbm %s4806_s2, %s3747_s11  ;;  %s233_s19 = scalar_lea.vmem [#allocation7], %s3744_s10 }
  0x70   : > { %s239_s8 = sshll.u32 %s233_s19, 4  ;;  %s3392_s6 = scalar_lea.hbm %s3909_s29, 6144  ;;  %s3912_s8 = int_to_ptr.vmem [resolvable:$true] %s239_s8 }
  0x71   : > { %p3393_p6 = scmp.ne.s32.totalorder %s3909_s29, %s3392_s6  ;;  %s3397_s27 = scalar_lea.hbm %s4806_s2, 18432 }
  0x72   : > { %p3398_p1 = scmp.lt.u32.totalorder %s3909_s29, %s4806_s2  ;;  %p3399_p12 = scmp.lt.u32.totalorder %s3397_s27, %s3392_s6 }
  0x73   : > { %p3395_p4 = pnand %p3393_p6, %p3770_p8  ;;  %p3401_p2 = scmp.lt.u32.totalorder %s3392_s6, %s3909_s29 }
  0x74   : > { %p3400_p10 = por %p3399_p12, %p3398_p1 }
  0x75   : > { %p3396_p11 = pneg %p3395_p4 }
  0x76   : > { %p3402_p9 = por %p3401_p2, %p3400_p10 }
  0x78   : > { %p3403_p0 = pnand %p3402_p9, %p3396_p11 }
  0x7a   : > { %3406 = shalt.err (!%p3403_p0)
}
  0x7b   : > { %s3407_s30 = scalar_lea.vmem %s3912_s8, 6144  ;;  %s3614_s14 = smov [#allocation7]  }
  0x7c   : > { %p3408_p13 = scmp.ne.s32.totalorder %s3912_s8, %s3407_s30  ;;  %s3412_s9 = sshll.u32 %s3614_s14, 4  ;;  %s3413_s9 = int_to_ptr.vmem [resolvable:$false] %s3412_s9 }
  0x7d   : > { %s3414_s19 = scalar_lea.vmem %s3413_s9, 12288  ;;  %p3415_p5 = scmp.lt.s32.totalorder %s3912_s8, %s3413_s9 }
  0x7e   : > { %p3410_p7 = pnand %p3408_p13, %p3770_p8  ;;  %p3416_p6 = scmp.lt.s32.totalorder %s3414_s19, %s3407_s30 }
  0x80   : > { %p3411_p3 = pneg %p3410_p7  ;;  %p3417_p4 = por %p3416_p6, %p3415_p5 }
  0x82   : > { %p3418_p1 = pnand %p3417_p4, %p3411_p3 }
  0x84   : > { %3421 = shalt.err (!%p3418_p1)
}
  0x85   : > { %p4865_p11 = scmp.ne.s32.totalorder %s4847_s5, 0  ;;  %s4866_s6 = smov 8  }
  0x86   : > { %s4867_s13 = smov 128   ;;  %s3943_s24 = scalar_lea.hbm %s4807_s3, %s3747_s11 }
  0x87   : > { %3098 = dma.hbm_to_vmem [thread:$0]  (!%p4865_p11), %s3909_s29, 6144, %s3912_s8, %s3764_s26, %s4864_s21, %s4867_s13, %s4866_s6  }
  0x88   : > { %s253_s23 = scalar_lea.vmem [#allocation8], %s3744_s10  ;;  %s4868_s14 = sand.u32 1, %s3574_s20  }
  0x89   : > { %s259_s30 = sshll.u32 %s253_s23, 4  ;;  %s3950_s9 = scalar_lea.sflag [#allocation9], %s4868_s14  ;;  %s3946_s30 = int_to_ptr.vmem [resolvable:$true] %s259_s30 }
  0x8a   : > { %s3422_s19 = scalar_lea.hbm %s3943_s24, 6144  ;;  %s3427_s11 = scalar_lea.hbm %s4807_s3, 18432 }
  0x8b   : > { %p3423_p12 = scmp.ne.s32.totalorder %s3943_s24, %s3422_s19  ;;  %p3428_p9 = scmp.lt.u32.totalorder %s3943_s24, %s4807_s3 }
  0x8c   : > { %p3429_p0 = scmp.lt.u32.totalorder %s3427_s11, %s3422_s19  ;;  %p3431_p7 = scmp.lt.u32.totalorder %s3422_s19, %s3943_s24 }
  0x8d   : > { %p3425_p10 = pnand %p3423_p12, %p3770_p8 }
  0x8e   : > { %p3430_p13 = por %p3429_p0, %p3428_p9 }
  0x8f   : > { %p3426_p2 = pneg %p3425_p10 }
  0x90   : > { %p3432_p3 = por %p3431_p7, %p3430_p13 }
  0x92   : > { %p3433_p5 = pnand %p3432_p3, %p3426_p2 }
  0x94   : > { %3436 = shalt.err (!%p3433_p5)
}
  0x95   : > { %s3437_s10 = scalar_lea.vmem %s3946_s30, 6144  ;;  %s3615_s27 = smov [#allocation8]  }
  0x96   : > { %p3438_p6 = scmp.ne.s32.totalorder %s3946_s30, %s3437_s10  ;;  %s3442_s23 = sshll.u32 %s3615_s27, 4  ;;  %s3443_s23 = int_to_ptr.vmem [resolvable:$false] %s3442_s23 }
  0x97   : > { %s3444_s14 = scalar_lea.vmem %s3443_s23, 12288  ;;  %p3445_p12 = scmp.lt.s32.totalorder %s3946_s30, %s3443_s23 }
  0x98   : > { %p3440_p4 = pnand %p3438_p6, %p3770_p8  ;;  %p3446_p10 = scmp.lt.s32.totalorder %s3444_s14, %s3437_s10 }
  0x9a   : > { %p3441_p1 = pneg %p3440_p4  ;;  %p3447_p9 = por %p3446_p10, %p3445_p12 }
  0x9c   : > { %p3448_p0 = pnand %p3447_p9, %p3441_p1 }
  0x9e   : > { %3451 = shalt.err (!%p3448_p0)
}
  0x9f   : > { %3101 = dma.hbm_to_vmem [thread:$0]  (!%p4865_p11), %s3943_s24, 6144, %s3946_s30, %s3950_s9, %s4864_s21, %s4867_s13, %s4866_s6  }
  0xa0   : > { %p4869_p8 = scmp.ne.s32.totalorder %s4849_s7, 0 }
  0xa1   : > { %s4870_s12 = sld [smem:[#allocation24_spill]] (!%p4869_p8)  ;;  %s273_s19 = sand.u32 (!%p4869_p8), 1, %s3582_s22  }
  0xa2   : > { %271 = sbr.rel (%p4869_p8) target bundleno = 1674 (0x68a), region = 36  ;;  %s274_s29 = scalar_lea.sflag (!%p4869_p8), [#allocation3], %s273_s19 }
  0xa3   : > { %s3076_s26 = smul.u32 (!%p4869_p8), 192, %s273_s19 }
  0xa5   : > { %s3980_s11 = scalar_lea.vmem (!%p4869_p8), [#allocation2], %s3076_s26 }
  0xa7   : > { %p4871_p2 = scmp.ne.s32.totalorder (!%p4869_p8), %s4870_s12, 0 }
  0xa9   : > { %3537 = dma.done.wait (%p4871_p2), %s274_s29, 3072  }
  0xaa   : > { %3539 = vsyncadd (%p4871_p2), %s274_s29, 4294964224  ;;  %s4872_s5 = sld [smem:[#allocation15_spill]]  ;;  %s4873_s8 = sld [smem:[#allocation25_spill]] }
  0xab   : > { %s282_s1 = sand.u32 1, %s3804_s4  }
  0xac   : > { %s283_s7 = scalar_lea.sflag [#allocation6], %s282_s1 }
  0xb0   : > { %s284_s21 = sand.u32 1, %s4872_s5   ;;  %p4874_p11 = scmp.ne.s32.totalorder %s4873_s8, 0 }
  0xb1   : > { %s3077_s6 = smul.u32 384, %s284_s21 }
  0xb3   : > { %s3988_s13 = scalar_lea.vmem [#allocation5], %s3077_s6 }
  0xb4   : > { %3541 = dma.done.wait (%p4874_p11), %s283_s7, 12288  }
  0xb5   : > { %3543 = vsyncadd (%p4874_p11), %s283_s7, 4294955008  ;;  %s3994_s24 = scalar_lea.vmem [#allocation7], %s3077_s6  ;;  %s301_s30 = scalar_lea.sflag [#allocation9], %s284_s21 }
  0xb6   : > { %s3996_s9 = scalar_lea.vmem [#allocation8], %s3077_s6 }
  0xb7   : > { %3545 = dma.done.wait (%p4874_p11), %s301_s30, 6144  }
  0xb8   : > { %3547 = vsyncadd (%p4874_p11), %s301_s30, 4294961152  ;;  %v384_v0 = vld [vmem:[%s3988_s13 + $0x80] sm:$0xff]  ;;  %v385_v1 = vld [vmem:[%s3988_s13 + $0x88] sm:$0xff]  ;;  %vm1169_vm0 = vcmask 523264   ;;  %s3616_s4 = smov 64   ;;  %s341_s10 = sand.u32 1, %s3558_s16  }
  0xb9   : > { %v368_v2 = vld [vmem:[%s3988_s13] sm:$0xff]  ;;  %v2799_v3 = vpack.c.bf16 %v385_v1, %v384_v0  ;;  %v369_v4 = vld [vmem:[%s3988_s13 + $0x8] sm:$0xff]  ;;  %v386_v9 = vld [vmem:[%s3988_s13 + $0x90] sm:$0xff]  ;;  %s2198_s27 = sshll.u32 %s341_s10, 6  ;;  %s4877_s23 = sld [smem:[#allocation18_spill]] }
  0xba   : > { %v400_v5 = vld [vmem:[%s3988_s13 + $0x100] sm:$0xff]  ;;  %v401_v6 = vld [vmem:[%s3988_s13 + $0x108] sm:$0xff]  ;;  %v2801_v7 = vpack.c.bf16 %v369_v4, %v368_v2  ;;  %v387_v10 = vld [vmem:[%s3988_s13 + $0x98] sm:$0xff]  ;;  %s4693_s14 = scalar_lea.vmem [#allocation10], %s2198_s27  ;;  %s4878_s12 = sld [smem:[#allocation17_spill]] }
  0xbb   : > { %v2831_v8 = vpack.c.bf16 %v401_v6, %v400_v5  ;;  %v370_v11 = vld [vmem:[%s3988_s13 + $0x10] sm:$0xff]  ;;  %2800 = vmatprep.subr.bf16.mxu0 %v2799_v3  ;;  %v2803_v12 = vpack.c.bf16 %v387_v10, %v386_v9  ;;  %v371_v13 = vld [vmem:[%s3988_s13 + $0x18] sm:$0xff]  ;;  %v388_v18 = vld [vmem:[%s3988_s13 + $0xa0] sm:$0xff]  ;;  %s2037_s29 = sshll.u32 %s4693_s14, 4  ;;  %s4879_s1 = sld [smem:[#allocation29_spill]]  ;;  %s4713_s29 = int_to_ptr.vmem [resolvable:$true] %s2037_s29 }
  0xbc   : > { %v402_v14 = vld [vmem:[%s3988_s13 + $0x110] sm:$0xff]  ;;  %v403_v15 = vld [vmem:[%s3988_s13 + $0x118] sm:$0xff]  ;;  %2802 = vmatpush3.bf16.msra.mxu0 %v2801_v7  ;;  %v2805_v16 = vpack.c.bf16 %v371_v13, %v370_v11  ;;  %v389_v19 = vld [vmem:[%s3988_s13 + $0xa8] sm:$0xff]  ;;  %s4728_s6 = scalar_lea.sflag [#allocation4], %s341_s10  ;;  %s3452_s7 = scalar_lea.vmem %s4713_s29, 1024 }
  0xbd   : > { %2832 = vmatprep.subr.bf16.mxu1 %v2831_v8  ;;  %v2835_v17 = vpack.c.bf16 %v403_v15, %v402_v14  ;;  %v372_v20 = vld [vmem:[%s3988_s13 + $0x20] sm:$0xff]  ;;  %2804 = vmatprep.subr.bf16.mxu0 %v2803_v12  ;;  %v2807_v21 = vpack.c.bf16 %v389_v19, %v388_v18  ;;  %v373_v22 = vld [vmem:[%s3988_s13 + $0x28] sm:$0xff]  ;;  %v390_v26 = vld [vmem:[%s3988_s13 + $0xb0] sm:$0xff]  ;;  %p3453_p13 = scmp.ne.s32.totalorder %s4713_s29, %s3452_s7  ;;  %p4880_p7 = scmp.ne.s32.totalorder %s4860_s18, 0 }
  0xbe   : > { %2834 = vmatpush3.bf16.msra.mxu1 %v2831_v8  ;;  %v404_v23 = vld [vmem:[%s3988_s13 + $0x120] sm:$0xff]  ;;  %v405_v24 = vld [vmem:[%s3988_s13 + $0x128] sm:$0xff]  ;;  %v391_v27 = vld [vmem:[%s3988_s13 + $0xb8] sm:$0xff]  ;;  %v2809_v30 = vpack.c.bf16 %v373_v22, %v372_v20 }
  0xbf   : > { %2836 = vmatprep.subr.bf16.mxu1 %v2835_v17  ;;  %v2839_v25 = vpack.c.bf16 %v405_v24, %v404_v23  ;;  %v406_v28 = vld [vmem:[%s3988_s13 + $0x130] sm:$0xff]  ;;  %v407_v29 = vld [vmem:[%s3988_s13 + $0x138] sm:$0xff]  ;;  %v2811_v31 = vpack.c.bf16 %v391_v27, %v390_v26  ;;  %v392_v35 = vld [vmem:[%s3988_s13 + $0xc0] sm:$0xff]  ;;  %s3078_s19 = smul.u32 24, %s4877_s23  ;;  %p3454_p3 = pnand %p3453_p13, %p4880_p7 }
  0xc0   : > { %2806 = vmatpush3.bf16.msra.mxu0 %v2805_v16  ;;  %v374_v32 = vld [vmem:[%s3988_s13 + $0x30] sm:$0xff]  ;;  %v375_v33 = vld [vmem:[%s3988_s13 + $0x38] sm:$0xff]  ;;  %v2843_v34 = vpack.c.bf16 %v407_v29, %v406_v28  ;;  %v393_v36 = vld [vmem:[%s3988_s13 + $0xc8] sm:$0xff] }
  0xc1   : > { %2808 = vmatprep.subr.bf16.mxu0 %v2807_v21  ;;  %v408_v37 = vld [vmem:[%s3988_s13 + $0x140] sm:$0xff]  ;;  %v409_v38 = vld [vmem:[%s3988_s13 + $0x148] sm:$0xff]  ;;  %v2813_v39 = vpack.c.bf16 %v375_v33, %v374_v32  ;;  %v2815_v40 = vpack.c.bf16 %v393_v36, %v392_v35  ;;  %v394_v44 = vld [vmem:[%s3988_s13 + $0xd0] sm:$0xff]  ;;  %s2034_s26 = sadd.s32 %s4878_s12, %s3078_s19  ;;  %p3455_p5 = pneg %p3454_p3 }
  0xc2   : > { %2838 = vmatpush3.bf16.msra.mxu1 %v2835_v17  ;;  %v376_v41 = vld [vmem:[%s3988_s13 + $0x40] sm:$0xff]  ;;  %v377_v42 = vld [vmem:[%s3988_s13 + $0x48] sm:$0xff]  ;;  %v2847_v43 = vpack.c.bf16 %v409_v38, %v408_v37  ;;  %v395_v45 = vld [vmem:[%s3988_s13 + $0xd8] sm:$0xff] }
  0xc3   : > { %2840 = vmatprep.subr.bf16.mxu1 %v2839_v25  ;;  %v410_v46 = vld [vmem:[%s3988_s13 + $0x150] sm:$0xff]  ;;  %v411_v47 = vld [vmem:[%s3988_s13 + $0x158] sm:$0xff]  ;;  %v2817_v48 = vpack.c.bf16 %v377_v42, %v376_v41  ;;  %v4037_v49 = vld [vmem:[%s3980_s11 + $0x8] sm:$0xff]  ;;  %v2819_v50 = vpack.c.bf16 %v395_v45, %v394_v44 }
  0xc4   : > { %2810 = vmatpush3.bf16.msra.mxu0 %v2809_v30  ;;  %v378_v51 = vld [vmem:[%s3988_s13 + $0x50] sm:$0xff]  ;;  %v379_v52 = vld [vmem:[%s3988_s13 + $0x58] sm:$0xff]  ;;  %v2851_v54 = vpack.c.bf16 %v411_v47, %v410_v46  ;;  %v396_v55 = vld [vmem:[%s3988_s13 + $0xe0] sm:$0xff]  ;;  %480 = vmatprep.mubr.f32.mxu0 %v4037_v49 }
  0xc5   : > { %2812 = vmatprep.subr.bf16.mxu0 %v2811_v31  ;;  %v4042_v53 = vld [vmem:[%s3980_s11 + $0x10] sm:$0xff]  ;;  %v397_v56 = vld [vmem:[%s3988_s13 + $0xe8] sm:$0xff]  ;;  %v412_v57 = vld [vmem:[%s3988_s13 + $0x160] sm:$0xff]  ;;  %v2821_v59 = vpack.c.bf16 %v379_v52, %v378_v51 }
  0xc6   : > { %2842 = vmatpush3.bf16.msra.mxu1 %v2839_v25  ;;  %v413_v58 = vld [vmem:[%s3988_s13 + $0x168] sm:$0xff]  ;;  %2587 = vmatprep.mubr.f32.mxu1 %v4042_v53  ;;  %v2823_v60 = vpack.c.bf16 %v397_v56, %v396_v55  ;;  %v380_v61 = vld [vmem:[%s3988_s13 + $0x60] sm:$0xff]  ;;  %v398_v0 = vld [vmem:[%s3988_s13 + $0xf0] sm:$0xff] }
  0xc7   : > { %2844 = vmatprep.subr.bf16.mxu1 %v2843_v34  ;;  %v381_v62 = vld [vmem:[%s3988_s13 + $0x68] sm:$0xff]  ;;  %v2855_v63 = vpack.c.bf16 %v413_v58, %v412_v57  ;;  %v399_v1 = vld [vmem:[%s3988_s13 + $0xf8] sm:$0xff]  ;;  %v414_v2 = vld [vmem:[%s3988_s13 + $0x170] sm:$0xff] }
  0xc8   : > { %2814 = vmatpush3.bf16.msra.mxu0 %v2813_v39  ;;  %v415_v3 = vld [vmem:[%s3988_s13 + $0x178] sm:$0xff]  ;;  %v2825_v4 = vpack.c.bf16 %v381_v62, %v380_v61  ;;  %v2827_v5 = vpack.c.bf16 %v399_v1, %v398_v0  ;;  %v382_v6 = vld [vmem:[%s3988_s13 + $0x70] sm:$0xff]  ;;  %v650_v9 = vld [vmem:[%s3994_s24 + $0x80] sm:$0xff] }
  0xc9   : > { %2816 = vmatprep.subr.bf16.mxu0 %v2815_v40  ;;  %v383_v7 = vld [vmem:[%s3988_s13 + $0x78] sm:$0xff]  ;;  %v2859_v8 = vpack.c.bf16 %v415_v3, %v414_v2  ;;  %v651_v10 = vld [vmem:[%s3994_s24 + $0x88] sm:$0xff]  ;;  %v666_v11 = vld [vmem:[%s3994_s24 + $0x100] sm:$0xff]  ;;  %s3617_s13 = smov [#allocation10]  }
  0xca   : > { %2846 = vmatpush3.bf16.msra.mxu1 %v2843_v34  ;;  %v667_v12 = vld [vmem:[%s3994_s24 + $0x108] sm:$0xff]  ;;  %v2829_v13 = vpack.c.bf16 %v383_v7, %v382_v6  ;;  %v2863_v14 = vpack.c.bf16 %v651_v10, %v650_v9  ;;  %v634_v15 = vld [vmem:[%s3994_s24] sm:$0xff]  ;;  %v652_v18 = vld [vmem:[%s3994_s24 + $0x90] sm:$0xff] }
  0xcb   : > { %2848 = vmatprep.subr.bf16.mxu1 %v2847_v43  ;;  %v635_v16 = vld [vmem:[%s3994_s24 + $0x8] sm:$0xff]  ;;  %v2895_v17 = vpack.c.bf16 %v667_v12, %v666_v11  ;;  %v653_v19 = vld [vmem:[%s3994_s24 + $0x98] sm:$0xff]  ;;  %v668_v20 = vld [vmem:[%s3994_s24 + $0x110] sm:$0xff] }
  0xcc   : > { %2818 = vmatpush3.bf16.msra.mxu0 %v2817_v48  ;;  %v669_v21 = vld [vmem:[%s3994_s24 + $0x118] sm:$0xff]  ;;  %v4069_v22 = vld [vmem:[%s3980_s11] sm:$0xff]  ;;  %v2865_v23 = vpack.c.bf16 %v635_v16, %v634_v15  ;;  %v4072_v24 = vld [vmem:[%s3980_s11 + $0x28] sm:$0xff]  ;;  %v2867_v28 = vpack.c.bf16 %v653_v19, %v652_v18 }
  0xcd   : > { %2820 = vmatprep.subr.bf16.mxu0 %v2819_v50  ;;  %v636_v25 = vld [vmem:[%s3994_s24 + $0x10] sm:$0xff]  ;;  %v637_v26 = vld [vmem:[%s3994_s24 + $0x18] sm:$0xff]  ;;  %v4077_v27 = vld [vmem:[%s3980_s11 + $0x20] sm:$0xff]  ;;  %v2899_v29 = vpack.c.bf16 %v669_v21, %v668_v20 }
  0xce   : > { %2850 = vmatpush3.bf16.msra.mxu1 %v2847_v43  ;;  %v654_v30 = vld [vmem:[%s3994_s24 + $0xa0] sm:$0xff]  ;;  %v655_v31 = vld [vmem:[%s3994_s24 + $0xa8] sm:$0xff]  ;;  %v4086_v34 = vld [vmem:[%s3980_s11 + $0x18] sm:$0xff]  ;;  %v2869_v35 = vpack.c.bf16 %v637_v26, %v636_v25 }
  0xcf   : > { %2852 = vmatprep.subr.bf16.mxu1 %v2851_v54  ;;  %v670_v32 = vld [vmem:[%s3994_s24 + $0x120] sm:$0xff]  ;;  %v671_v33 = vld [vmem:[%s3994_s24 + $0x128] sm:$0xff]  ;;  %v4093_v37 = vld [vmem:[%s3980_s11 + $0x38] sm:$0xff]  ;;  %v2871_v38 = vpack.c.bf16 %v655_v31, %v654_v30 }
  0xd0   : > { %2822 = vmatpush3.bf16.msra.mxu0 %v2821_v59  ;;  %v4089_v36 = vld [vmem:[%s3980_s11 + $0x40] sm:$0xff]  ;;  %v639_v40 = vld [vmem:[%s3994_s24 + $0x28] sm:$0xff]  ;;  %v2903_v41 = vpack.c.bf16 %v671_v33, %v670_v32  ;;  %v656_v42 = vld [vmem:[%s3994_s24 + $0xb0] sm:$0xff] }
  0xd1   : > { %2824 = vmatprep.subr.bf16.mxu0 %v2823_v60  ;;  %v638_v39 = vld [vmem:[%s3994_s24 + $0x20] sm:$0xff]  ;;  %v657_v43 = vld [vmem:[%s3994_s24 + $0xb8] sm:$0xff]  ;;  %v672_v45 = vld [vmem:[%s3994_s24 + $0x130] sm:$0xff] }
  0xd2   : > { %2854 = vmatpush3.bf16.msra.mxu1 %v2851_v54  ;;  %v4102_v44 = vld [vmem:[%s3980_s11 + $0x58] sm:$0xff]  ;;  %v4108_v47 = vld [vmem:[%s3980_s11 + $0x30] sm:$0xff]  ;;  %v2873_v48 = vpack.c.bf16 %v639_v40, %v638_v39  ;;  %v2875_v52 = vpack.c.bf16 %v657_v43, %v656_v42  ;;  %v658_v57 = vld [vmem:[%s3994_s24 + $0xc0] sm:$0xff] }
  0xd3   : > { %2856 = vmatprep.subr.bf16.mxu1 %v2855_v63  ;;  %v673_v46 = vld [vmem:[%s3994_s24 + $0x138] sm:$0xff]  ;;  %v4111_v50 = vld [vmem:[%s3980_s11 + $0x70] sm:$0xff]  ;;  %v659_v58 = vld [vmem:[%s3994_s24 + $0xc8] sm:$0xff] }
  0xd4   : > { %2826 = vmatpush3.bf16.msra.mxu0 %v2825_v4  ;;  %v4114_v51 = vld [vmem:[%s3980_s11 + $0x50] sm:$0xff]  ;;  %v641_v55 = vld [vmem:[%s3994_s24 + $0x38] sm:$0xff]  ;;  %v2907_v56 = vpack.c.bf16 %v673_v46, %v672_v45  ;;  %v4124_v59 = vld [vmem:[%s3980_s11 + $0x88] sm:$0xff]  ;;  %v2879_v2 = vpack.c.bf16 %v659_v58, %v658_v57 }
  0xd5   : > { %2828 = vmatprep.subr.bf16.mxu0 %v2827_v5  ;;  %v640_v54 = vld [vmem:[%s3994_s24 + $0x30] sm:$0xff]  ;;  %v674_v60 = vld [vmem:[%s3994_s24 + $0x140] sm:$0xff]  ;;  %v675_v61 = vld [vmem:[%s3994_s24 + $0x148] sm:$0xff] }
  0xd6   : > { %2858 = vmatpush3.bf16.msra.mxu1 %v2855_v63  ;;  %v4130_v62 = vld [vmem:[%s3980_s11 + $0x48] sm:$0xff]  ;;  %v2877_v63 = vpack.c.bf16 %v641_v55, %v640_v54  ;;  %v4133_v0 = vld [vmem:[%s3980_s11 + $0xa0] sm:$0xff]  ;;  %v2911_v5 = vpack.c.bf16 %v675_v61, %v674_v60  ;;  %v660_v6 = vld [vmem:[%s3994_s24 + $0xd0] sm:$0xff] }
  0xd7   : > { %2860 = vmatprep.subr.bf16.mxu1 %v2859_v8  ;;  %v4136_v1 = vld [vmem:[%s3980_s11 + $0x68] sm:$0xff]  ;;  %v642_v3 = vld [vmem:[%s3994_s24 + $0x40] sm:$0xff]  ;;  %v661_v7 = vld [vmem:[%s3994_s24 + $0xd8] sm:$0xff] }
  0xd8   : > { %2830 = vmatpush3.bf16.msra.mxu0 %v2829_v13  ;;  %v643_v4 = vld [vmem:[%s3994_s24 + $0x48] sm:$0xff]  ;;  %v677_v9 = vld [vmem:[%s3994_s24 + $0x158] sm:$0xff]  ;;  %v4152_v11 = vld [vmem:[%s3980_s11 + $0x60] sm:$0xff] }
  0xd9   : > { %2864 = vmatprep.subr.bf16.mxu0 %v2863_v14  ;;  %v4148_v10 = vld [vmem:[%s3980_s11 + $0xb8] sm:$0xff]  ;;  %v2881_v12 = vpack.c.bf16 %v643_v4, %v642_v3  ;;  %v4155_v13 = vld [vmem:[%s3980_s11 + $0x80] sm:$0xff]  ;;  %v2883_v14 = vpack.c.bf16 %v661_v7, %v660_v6  ;;  %v644_v15 = vld [vmem:[%s3994_s24 + $0x50] sm:$0xff] }
  0xda   : > { %2862 = vmatpush3.bf16.msra.mxu1 %v2859_v8  ;;  %v676_v8 = vld [vmem:[%s3994_s24 + $0x150] sm:$0xff]  ;;  %v645_v16 = vld [vmem:[%s3994_s24 + $0x58] sm:$0xff]  ;;  %v662_v18 = vld [vmem:[%s3994_s24 + $0xe0] sm:$0xff] }
  0xdb   : > { %2896 = vmatprep.subr.bf16.mxu1 %v2895_v17  ;;  %481 = vmatmul.mubr.f32.vlgmr.msra.gmra.mrb[0].mxu0 %v4069_v22  ;;  %v663_v19 = vld [vmem:[%s3994_s24 + $0xe8] sm:$0xff]  ;;  %v678_v20 = vld [vmem:[%s3994_s24 + $0x160] sm:$0xff]  ;;  %v2885_v25 = vpack.c.bf16 %v645_v16, %v644_v15  ;;  %v4171_v26 = vld [vmem:[%s3980_s11 + $0x98] sm:$0xff] }
  0xdc   : > { %2866 = vmatpush3.bf16.msra.mxu0 %v2865_v23  ;;  %485 = vmatprep.mubr.f32.mxu0 %v4077_v27  ;;  %v679_v21 = vld [vmem:[%s3994_s24 + $0x168] sm:$0xff]  ;;  %v4168_v23 = vld [vmem:[%s3980_s11 + $0x78] sm:$0xff]  ;;  %v664_v32 = vld [vmem:[%s3994_s24 + $0xf0] sm:$0xff] }
  0xdd   : > { %2588 = vmatmul.mubr.f32.vlgmr.msra.gmra.mrb[0].mxu1 %v4072_v24  ;;  %2868 = vmatprep.subr.bf16.mxu0 %v2867_v28  ;;  %v2887_v28 = vpack.c.bf16 %v663_v19, %v662_v18  ;;  %v647_v30 = vld [vmem:[%s3994_s24 + $0x68] sm:$0xff]  ;;  %v2919_v31 = vpack.c.bf16 %v679_v21, %v678_v20  ;;  %v665_v33 = vld [vmem:[%s3994_s24 + $0xf8] sm:$0xff]  ;;  %v4182_v39 = vld [vmem:[%s3980_s11 + $0x90] sm:$0xff] }
  0xde   : > { %2898 = vmatpush3.bf16.msra.mxu1 %v2895_v17  ;;  %2590 = vmatprep.mubr.f32.mxu1 %v4089_v36  ;;  %v2915_v17 = vpack.c.bf16 %v677_v9, %v676_v8  ;;  %v2891_v42 = vpack.c.bf16 %v665_v33, %v664_v32  ;;  %v648_v43 = vld [vmem:[%s3994_s24 + $0x70] sm:$0xff]  ;;  %v649_v45 = vld [vmem:[%s3994_s24 + $0x78] sm:$0xff]  ;;  %v924_v54 = vld [vmem:[%s3996_s9 + $0x100] sm:$0xff] }
  0xdf   : > { %2900 = vmatprep.subr.bf16.mxu1 %v2899_v29  ;;  %486 = vmatmul.mubr.f32.gmra.mrb[2].mxu0 %v4086_v34  ;;  %v925_v55 = vld [vmem:[%s3996_s9 + $0x108] sm:$0xff]  ;;  %v2893_v57 = vpack.c.bf16 %v649_v45, %v648_v43  ;;  %v892_v60 = vld [vmem:[%s3996_s9] sm:$0xff]  ;;  %v911_v3 = vld [vmem:[%s3996_s9 + $0x98] sm:$0xff] }
  0xe0   : > { %2870 = vmatpush3.bf16.msra.mxu0 %v2869_v35  ;;  %490 = vmatprep.mubr.f32.mxu0 %v4093_v37  ;;  %v680_v35 = vld [vmem:[%s3994_s24 + $0x170] sm:$0xff]  ;;  %v893_v61 = vld [vmem:[%s3996_s9 + $0x8] sm:$0xff]  ;;  %v895_v9 = vld [vmem:[%s3996_s9 + $0x18] sm:$0xff] }
  0xe1   : > { %2872 = vmatprep.subr.bf16.mxu0 %v2871_v38  ;;  %2591 = vmatmul.mubr.f32.gmra.mrb[2].mxu1 %v4102_v44  ;;  %v681_v38 = vld [vmem:[%s3994_s24 + $0x178] sm:$0xff]  ;;  %v926_v4 = vld [vmem:[%s3996_s9 + $0x110] sm:$0xff]  ;;  %v2929_v6 = vpack.c.bf16 %v893_v61, %v892_v60  ;;  %v928_v16 = vld [vmem:[%s3996_s9 + $0x120] sm:$0xff] }
  0xe2   : > { %2902 = vmatpush3.bf16.msra.mxu1 %v2899_v29  ;;  %2593 = vmatprep.mubr.f32.mxu1 %v4111_v50  ;;  %v646_v29 = vld [vmem:[%s3994_s24 + $0x60] sm:$0xff]  ;;  %v2923_v46 = vpack.c.bf16 %v681_v38, %v680_v35  ;;  %v894_v8 = vld [vmem:[%s3996_s9 + $0x10] sm:$0xff]  ;;  %v897_v21 = vld [vmem:[%s3996_s9 + $0x28] sm:$0xff]  ;;  %s3456_s24 = sshll.u32 %s3617_s13, 4  ;;  %s3457_s24 = int_to_ptr.vmem [resolvable:$false] %s3456_s24 }
  0xe3   : > { %2904 = vmatprep.subr.bf16.mxu1 %v2903_v41  ;;  %491 = vmatmul.mubr.f32.gmra.mrb[4].mxu0 %v4108_v47  ;;  %v2889_v40 = vpack.c.bf16 %v647_v30, %v646_v29  ;;  %v2933_v18 = vpack.c.bf16 %v895_v9, %v894_v8  ;;  %v896_v20 = vld [vmem:[%s3996_s9 + $0x20] sm:$0xff]  ;;  %v930_v30 = vld [vmem:[%s3996_s9 + $0x130] sm:$0xff]  ;;  %v899_v38 = vld [vmem:[%s3996_s9 + $0x38] sm:$0xff]  ;;  %s3458_s30 = scalar_lea.vmem %s3457_s24, 2048  ;;  %p3459_p6 = scmp.lt.s32.totalorder %s4713_s29, %s3457_s24 }
  0xe4   : > { %2874 = vmatpush3.bf16.msra.mxu0 %v2873_v48  ;;  %495 = vmatprep.mubr.f32.mxu0 %v4114_v51  ;;  %v908_v48 = vld [vmem:[%s3996_s9 + $0x80] sm:$0xff]  ;;  %v2937_v32 = vpack.c.bf16 %v897_v21, %v896_v20  ;;  %v898_v35 = vld [vmem:[%s3996_s9 + $0x30] sm:$0xff]  ;;  %v939_v21 = vld [vmem:[%s3996_s9 + $0x178] sm:$0xff]  ;;  %p3460_p4 = scmp.lt.s32.totalorder %s3458_s30, %s3452_s7 }
  0xe5   : > { %2876 = vmatprep.subr.bf16.mxu0 %v2875_v52  ;;  %2594 = vmatmul.mubr.f32.gmra.mrb[4].mxu1 %v4124_v59  ;;  %v909_v52 = vld [vmem:[%s3996_s9 + $0x88] sm:$0xff]  ;;  %v932_v45 = vld [vmem:[%s3996_s9 + $0x140] sm:$0xff]  ;;  %v934_v61 = vld [vmem:[%s3996_s9 + $0x150] sm:$0xff] }
  0xe6   : > { %2906 = vmatpush3.bf16.msra.mxu1 %v2903_v41  ;;  %2596 = vmatprep.mubr.f32.mxu1 %v4133_v0  ;;  %v4185_v41 = vld [vmem:[%s3980_s11 + $0xb0] sm:$0xff]  ;;  %v2927_v58 = vpack.c.bf16 %v909_v52, %v908_v48  ;;  %v2941_v48 = vpack.c.bf16 %v899_v38, %v898_v35  ;;  %v936_v9 = vld [vmem:[%s3996_s9 + $0x160] sm:$0xff]  ;;  %vm4310_vm1 = vmpackc.low %vm1169_vm0, %vm1169_vm0  ;;  %p3461_p1 = por %p3460_p4, %p3459_p6 }
  0xe7   : > { %2908 = vmatprep.subr.bf16.mxu1 %v2907_v56  ;;  %496 = vmatmul.mubr.f32.gmra.mrb[6].mxu0 %v4130_v62  ;;  %v938_v20 = vld [vmem:[%s3996_s9 + $0x170] sm:$0xff] }
  0xe8   : > { %2878 = vmatpush3.bf16.msra.mxu0 %v2877_v63  ;;  %500 = vmatprep.mubr.f32.mxu0 %v4136_v1  ;;  %v2959_v63 = vpack.c.bf16 %v925_v55, %v924_v54  ;;  %v900_v54 = vld [vmem:[%s3996_s9 + $0x40] sm:$0xff]  ;;  %v901_v55 = vld [vmem:[%s3996_s9 + $0x48] sm:$0xff]  ;;  %p3462_p12 = pnand %p3461_p1, %p3455_p5 }
  0xe9   : > { %2880 = vmatprep.subr.bf16.mxu0 %v2879_v2  ;;  %2597 = vmatmul.mubr.f32.gmra.mrb[6].mxu1 %v4148_v10  ;;  %v910_v2 = vld [vmem:[%s3996_s9 + $0x90] sm:$0xff] }
  0xea   : > { %2910 = vmatpush3.bf16.msra.mxu1 %v2907_v56  ;;  %2631 = vmatprep.mubr.f32.mxu1 %v4042_v53  ;;  %v4196_v56 = vld [vmem:[%s3980_s11 + $0xa8] sm:$0xff]  ;;  %v2931_v7 = vpack.c.bf16 %v911_v3, %v910_v2  ;;  %v2945_v2 = vpack.c.bf16 %v901_v55, %v900_v54  ;;  %s2248_s11 = sshll.u32 %s2034_s26, 7 }
  0xeb   : > { %2912 = vmatprep.subr.bf16.mxu1 %v2911_v5  ;;  %501 = vmatmul.mubr.f32.gmra.mrb[8].mxu0 %v4152_v11  ;;  %s4722_s21 = scalar_lea.hbm %s4879_s1, %s2248_s11 }
  0xec   : > { %2882 = vmatpush3.bf16.msra.mxu0 %v2881_v12  ;;  %505 = vmatprep.mubr.f32.mxu0 %v4155_v13  ;;  %v912_v12 = vld [vmem:[%s3996_s9 + $0xa0] sm:$0xff] }
  0xed   : > { %2884 = vmatprep.subr.bf16.mxu0 %v2883_v14  ;;  %v913_v14 = vld [vmem:[%s3996_s9 + $0xa8] sm:$0xff] }
  0xee   : > { %2914 = vmatpush3.bf16.msra.mxu1 %v2911_v5  ;;  %v927_v5 = vld [vmem:[%s3996_s9 + $0x118] sm:$0xff]  ;;  %v2935_v19 = vpack.c.bf16 %v913_v14, %v912_v12 }
  0xef   : > { %2916 = vmatprep.subr.bf16.mxu1 %v2915_v17  ;;  %506 = vmatmul.mubr.f32.gmra.mrb[10].mxu0 %v4168_v23  ;;  %v2963_v15 = vpack.c.bf16 %v927_v5, %v926_v4  ;;  %v902_v4 = vld [vmem:[%s3996_s9 + $0x50] sm:$0xff]  ;;  %v903_v5 = vld [vmem:[%s3996_s9 + $0x58] sm:$0xff] }
  0xf0   : > { %2886 = vmatpush3.bf16.msra.mxu0 %v2885_v25  ;;  %510 = vmatprep.mubr.f32.mxu0 %v4171_v26  ;;  %v914_v25 = vld [vmem:[%s3996_s9 + $0xb0] sm:$0xff]  ;;  %v2949_v12 = vpack.c.bf16 %v903_v5, %v902_v4 }
  0xf1   : > { %2888 = vmatprep.subr.bf16.mxu0 %v2887_v28  ;;  %v915_v28 = vld [vmem:[%s3996_s9 + $0xb8] sm:$0xff] }
  0xf2   : > { %2918 = vmatpush3.bf16.msra.mxu1 %v2915_v17  ;;  %v929_v17 = vld [vmem:[%s3996_s9 + $0x128] sm:$0xff]  ;;  %v2939_v33 = vpack.c.bf16 %v915_v28, %v914_v25 }
  0xf3   : > { %2920 = vmatprep.subr.bf16.mxu1 %v2919_v31  ;;  %511 = vmatmul.mubr.f32.gmra.mrb[12].mxu0 %v4182_v39  ;;  %v2967_v29 = vpack.c.bf16 %v929_v17, %v928_v16  ;;  %v905_v16 = vld [vmem:[%s3996_s9 + $0x68] sm:$0xff]  ;;  %v922_v17 = vld [vmem:[%s3996_s9 + $0xf0] sm:$0xff] }
  0xf4   : > { %2890 = vmatpush3.bf16.msra.mxu0 %v2889_v40  ;;  %515 = vmatprep.mubr.f32.mxu0 %v4185_v41  ;;  %v916_v40 = vld [vmem:[%s3996_s9 + $0xc0] sm:$0xff] }
  0xf5   : > { %2892 = vmatprep.subr.bf16.mxu0 %v2891_v42  ;;  %v917_v42 = vld [vmem:[%s3996_s9 + $0xc8] sm:$0xff] }
  0xf6   : > { %2922 = vmatpush3.bf16.msra.mxu1 %v2919_v31  ;;  %v931_v31 = vld [vmem:[%s3996_s9 + $0x138] sm:$0xff]  ;;  %v2943_v52 = vpack.c.bf16 %v917_v42, %v916_v40 }
  0xf7   : > { %2924 = vmatprep.subr.bf16.mxu1 %v2923_v46  ;;  %516 = vmatmul.mubr.f32.gmra.mrb[14].mxu0 %v4196_v56  ;;  %v2971_v43 = vpack.c.bf16 %v931_v31, %v930_v30  ;;  %v907_v30 = vld [vmem:[%s3996_s9 + $0x78] sm:$0xff]  ;;  %v2987_v31 = vpack.c.bf16 %v939_v21, %v938_v20 }
  0xf8   : > { %2894 = vmatpush3.bf16.msra.mxu0 %v2893_v57  ;;  %746 = vmatprep.mubr.f32.mxu0 %v4037_v49  ;;  %v918_v57 = vld [vmem:[%s3996_s9 + $0xd0] sm:$0xff] }
  0xf9   : > { %2928 = vmatprep.subr.bf16.mxu0 %v2927_v58  ;;  %v919_v58 = vld [vmem:[%s3996_s9 + $0xd8] sm:$0xff] }
  0xfa   : > { %2926 = vmatpush3.bf16.msra.mxu1 %v2923_v46  ;;  %v933_v46 = vld [vmem:[%s3996_s9 + $0x148] sm:$0xff]  ;;  %v2947_v3 = vpack.c.bf16 %v919_v58, %v918_v57 }
  0xfb   : > { %2960 = vmatprep.subr.bf16.mxu1 %v2959_v63  ;;  %747 = vmatmul.mubr.f32.vlgmr.msra.gmra.mrb[16].mxu0 %v4069_v22  ;;  %v2975_v60 = vpack.c.bf16 %v933_v46, %v932_v45 }
  0xfc   : > { %751 = vmatprep.mubr.f32.mxu0 %v4077_v27  ;;  %2930 = vmatpush3.bf16.msra.mxu0 %v2929_v6  ;;  %v920_v6 = vld [vmem:[%s3996_s9 + $0xe0] sm:$0xff] }
  0xfd   : > { %2632 = vmatmul.mubr.f32.vlgmr.msra.gmra.mrb[8].mxu1 %v4072_v24  ;;  %2932 = vmatprep.subr.bf16.mxu0 %v2931_v7  ;;  %v921_v7 = vld [vmem:[%s3996_s9 + $0xe8] sm:$0xff] }
  0xfe   : > { %2634 = vmatprep.mubr.f32.mxu1 %v4089_v36  ;;  %2962 = vmatpush3.bf16.msra.mxu1 %v2959_v63  ;;  %v935_v63 = vld [vmem:[%s3996_s9 + $0x158] sm:$0xff]  ;;  %v2951_v14 = vpack.c.bf16 %v921_v7, %v920_v6 }
  0xff   : > { %752 = vmatmul.mubr.f32.gmra.mrb[18].mxu0 %v4086_v34  ;;  %2964 = vmatprep.subr.bf16.mxu1 %v2963_v15  ;;  %v2979_v8 = vpack.c.bf16 %v935_v63, %v934_v61 }
 0x100   : > { %756 = vmatprep.mubr.f32.mxu0 %v4093_v37  ;;  %2934 = vmatpush3.bf16.msra.mxu0 %v2933_v18  ;;  %v923_v18 = vld [vmem:[%s3996_s9 + $0xf8] sm:$0xff] }
 0x101   : > { %2635 = vmatmul.mubr.f32.gmra.mrb[10].mxu1 %v4102_v44  ;;  %2936 = vmatprep.subr.bf16.mxu0 %v2935_v19  ;;  %v2955_v28 = vpack.c.bf16 %v923_v18, %v922_v17 }
 0x102   : > { %2637 = vmatprep.mubr.f32.mxu1 %v4111_v50  ;;  %2966 = vmatpush3.bf16.msra.mxu1 %v2963_v15  ;;  %v904_v15 = vld [vmem:[%s3996_s9 + $0x60] sm:$0xff] }
 0x103   : > { %757 = vmatmul.mubr.f32.gmra.mrb[20].mxu0 %v4108_v47  ;;  %2968 = vmatprep.subr.bf16.mxu1 %v2967_v29  ;;  %v2953_v25 = vpack.c.bf16 %v905_v16, %v904_v15 }
 0x104   : > { %761 = vmatprep.mubr.f32.mxu0 %v4114_v51  ;;  %2938 = vmatpush3.bf16.msra.mxu0 %v2937_v32 }
 0x105   : > { %2638 = vmatmul.mubr.f32.gmra.mrb[12].mxu1 %v4124_v59  ;;  %2940 = vmatprep.subr.bf16.mxu0 %v2939_v33 }
 0x106   : > { %2640 = vmatprep.mubr.f32.mxu1 %v4133_v0  ;;  %2970 = vmatpush3.bf16.msra.mxu1 %v2967_v29  ;;  %v906_v29 = vld [vmem:[%s3996_s9 + $0x70] sm:$0xff] }
 0x107   : > { %762 = vmatmul.mubr.f32.gmra.mrb[22].mxu0 %v4130_v62  ;;  %2972 = vmatprep.subr.bf16.mxu1 %v2971_v43  ;;  %v2957_v32 = vpack.c.bf16 %v907_v30, %v906_v29 }
 0x108   : > { %766 = vmatprep.mubr.f32.mxu0 %v4136_v1  ;;  %2942 = vmatpush3.bf16.msra.mxu0 %v2941_v48 }
 0x109   : > { %2641 = vmatmul.mubr.f32.gmra.mrb[14].mxu1 %v4148_v10  ;;  %2944 = vmatprep.subr.bf16.mxu0 %v2943_v52 }
 0x10a   : > { %2675 = vmatprep.mubr.f32.mxu1 %v4042_v53  ;;  %2974 = vmatpush3.bf16.msra.mxu1 %v2971_v43  ;;  %v937_v53 = vld [vmem:[%s3996_s9 + $0x168] sm:$0xff] }
 0x10b   : > { %767 = vmatmul.mubr.f32.gmra.mrb[24].mxu0 %v4152_v11  ;;  %2976 = vmatprep.subr.bf16.mxu1 %v2975_v60  ;;  %v2983_v19 = vpack.c.bf16 %v937_v53, %v936_v9 }
 0x10c   : > { %771 = vmatprep.mubr.f32.mxu0 %v4155_v13  ;;  %2946 = vmatpush3.bf16.msra.mxu0 %v2945_v2 }
 0x10d   : > { %2948 = vmatprep.subr.bf16.mxu0 %v2947_v3 }
 0x10e   : > { %2978 = vmatpush3.bf16.msra.mxu1 %v2975_v60 }
 0x10f   : > { %772 = vmatmul.mubr.f32.gmra.mrb[26].mxu0 %v4168_v23  ;;  %2980 = vmatprep.subr.bf16.mxu1 %v2979_v8 }
 0x110   : > { %776 = vmatprep.mubr.f32.mxu0 %v4171_v26  ;;  %2950 = vmatpush3.bf16.msra.mxu0 %v2949_v12 }
 0x111   : > { %2952 = vmatprep.subr.bf16.mxu0 %v2951_v14 }
 0x112   : > { %2982 = vmatpush3.bf16.msra.mxu1 %v2979_v8 }
 0x113   : > { %777 = vmatmul.mubr.f32.gmra.mrb[28].mxu0 %v4182_v39  ;;  %2984 = vmatprep.subr.bf16.mxu1 %v2983_v19 }
 0x114   : > { %781 = vmatprep.mubr.f32.mxu0 %v4185_v41  ;;  %2954 = vmatpush3.bf16.msra.mxu0 %v2953_v25 }
 0x115   : > { %2956 = vmatprep.subr.bf16.mxu0 %v2955_v28 }
 0x116   : > { %2986 = vmatpush3.bf16.msra.mxu1 %v2983_v19 }
 0x117   : > { %782 = vmatmul.mubr.f32.gmra.mrb[30].mxu0 %v4196_v56  ;;  %2988 = vmatprep.subr.bf16.mxu1 %v2987_v31 }
 0x118   : > { %1004 = vmatprep.mubr.f32.mxu0 %v4037_v49  ;;  %2958 = vmatpush3.bf16.msra.mxu0 %v2957_v32 }
 0x11a   : > { %2990 = vmatpush3.bf16.msra.mxu1 %v2987_v31 }
 0x11b   : > { %1005 = vmatmul.mubr.f32.vlgmr.msra.gmra.mrb[32].mxu0 %v4069_v22 }
 0x11c   : > { %1009 = vmatprep.mubr.f32.mxu0 %v4077_v27 }
 0x11d   : > { %2676 = vmatmul.mubr.f32.vlgmr.msra.gmra.mrb[16].mxu1 %v4072_v24 }
 0x11e   : > { %2678 = vmatprep.mubr.f32.mxu1 %v4089_v36 }
 0x11f   : > { %1010 = vmatmul.mubr.f32.gmra.mrb[34].mxu0 %v4086_v34 }
 0x120   : > { %1014 = vmatprep.mubr.f32.mxu0 %v4093_v37 }
 0x121   : > { %2679 = vmatmul.mubr.f32.gmra.mrb[18].mxu1 %v4102_v44 }
 0x122   : > { %2681 = vmatprep.mubr.f32.mxu1 %v4111_v50 }
 0x123   : > { %1015 = vmatmul.mubr.f32.gmra.mrb[36].mxu0 %v4108_v47 }
 0x124   : > { %1019 = vmatprep.mubr.f32.mxu0 %v4114_v51 }
 0x125   : > { %2682 = vmatmul.mubr.f32.gmra.mrb[20].mxu1 %v4124_v59 }
 0x126   : > { %2684 = vmatprep.mubr.f32.mxu1 %v4133_v0 }
 0x127   : > { %1020 = vmatmul.mubr.f32.gmra.mrb[38].mxu0 %v4130_v62 }
 0x128   : > { %1024 = vmatprep.mubr.f32.mxu0 %v4136_v1 }
 0x129   : > { %2685 = vmatmul.mubr.f32.gmra.mrb[22].mxu1 %v4148_v10 }
 0x12b   : > { %1025 = vmatmul.mubr.f32.gmra.mrb[40].mxu0 %v4152_v11 }
 0x12c   : > { %1029 = vmatprep.mubr.f32.mxu0 %v4155_v13 }
 0x12f   : > { %1030 = vmatmul.mubr.f32.gmra.mrb[42].mxu0 %v4168_v23 }
 0x130   : > { %1034 = vmatprep.mubr.f32.mxu0 %v4171_v26 }
 0x133   : > { %1035 = vmatmul.mubr.f32.gmra.mrb[44].mxu0 %v4182_v39 }
 0x134   : > { %1039 = vmatprep.mubr.f32.mxu0 %v4185_v41 }
 0x137   : > { %1040 = vmatmul.mubr.f32.gmra.mrb[46].mxu0 %v4196_v56 }
 0x1ae   : > { %v2283_v49 = vpop.f32.mrb[0].mxu0 }
 0x1af   : > { %v2284_v22 = vpop.f32.mrb[1].mxu0 }
 0x1b0   : > { %v2589_v24 = vpop.f32.mrb[0].mxu1  ;;  %v2285_v27 = vadd.f32 %v2284_v22, %v2283_v49 }
 0x1b1   : > { %v587_v34 = vpop.f32.mrb[1].mxu1 }
 0x1b2   : > { %v588_v36 = vadd.f32 %v2285_v27, %v587_v34  ;;  %v2286_v37 = vpop.f32.mrb[2].mxu0 }
 0x1b3   : > { %v2287_v44 = vpop.f32.mrb[3].mxu0 }
 0x1b4   : > { %v4290_v47 = vmul.f32 0.05103104, %v588_v36  ;;  %v2288_v50 = vadd.f32 %v2287_v44, %v2286_v37  ;;  %v2592_v51 = vpop.f32.mrb[2].mxu1 }
 0x1b5   : > { %v597_v0 = vpop.f32.mrb[3].mxu1 }
 0x1b6   : > { %v4292_v59 = vadd.f32 %v2589_v24, %v2288_v50  ;;  %v2289_v62 = vpop.f32.mrb[4].mxu0  ;;  %2703 = vmatprep.mubr.msk.f32.mxu0 %vm1169_vm0, %v4290_v47 }
 0x1b7   : > { %v2290_v1 = vpop.f32.mrb[5].mxu0 }
 0x1b8   : > { %v2291_v10 = vadd.f32 %v2290_v1, %v2289_v62  ;;  %v2595_v11 = vpop.f32.mrb[4].mxu1 }
 0x1b9   : > { %v607_v26 = vpop.f32.mrb[5].mxu1 }
 0x1ba   : > { %v4296_v13 = vadd.f32 %v2291_v10, %v597_v0  ;;  %v2292_v23 = vpop.f32.mrb[6].mxu0 }
 0x1bb   : > { %v2293_v39 = vpop.f32.mrb[7].mxu0 }
 0x1bc   : > { %v2294_v41 = vadd.f32 %v2293_v39, %v2292_v23  ;;  %v2598_v56 = vpop.f32.mrb[6].mxu1 }
 0x1bd   : > { %v617_v38 = vpop.f32.mrb[7].mxu1 }
 0x1be   : > { %v4298_v33 = vadd.f32 %v2592_v51, %v2294_v41  ;;  %v2295_v35 = vpop.f32.mrb[8].mxu0 }
 0x1bf   : > { %v2296_v40 = vpop.f32.mrb[9].mxu0 }
 0x1c0   : > { %v2297_v42 = vadd.f32 %v2296_v40, %v2295_v35 }
 0x1c2   : > { %v4300_v43 = vadd.f32 %v2297_v42, %v607_v26  ;;  %v2298_v45 = vpop.f32.mrb[10].mxu0 }
 0x1c3   : > { %v2299_v46 = vpop.f32.mrb[11].mxu0 }
 0x1c4   : > { %v2300_v48 = vadd.f32 %v2299_v46, %v2298_v45 }
 0x1c6   : > { %v4302_v52 = vadd.f32 %v2595_v11, %v2300_v48  ;;  %v2301_v54 = vpop.f32.mrb[12].mxu0 }
 0x1c7   : > { %v2302_v55 = vpop.f32.mrb[13].mxu0 }
 0x1c8   : > { %v2303_v57 = vadd.f32 %v2302_v55, %v2301_v54 }
 0x1ca   : > { %v4304_v58 = vadd.f32 %v2303_v57, %v617_v38  ;;  %v2304_v60 = vpop.f32.mrb[14].mxu0 }
 0x1cb   : > { %v2305_v61 = vpop.f32.mrb[15].mxu0 }
 0x1cc   : > { %v2306_v63 = vadd.f32 %v2305_v61, %v2304_v60 }
 0x1ce   : > { %v4306_v2 = vadd.f32 %v2598_v56, %v2306_v63  ;;  %v2363_v3 = vpop.f32.mrb[16].mxu0 }
 0x1cf   : > { %v2364_v4 = vpop.f32.mrb[17].mxu0 }
 0x1d0   : > { %v2633_v5 = vpop.f32.mrb[8].mxu1  ;;  %v2365_v6 = vadd.f32 %v2364_v4, %v2363_v3 }
 0x1d1   : > { %v853_v7 = vpop.f32.mrb[9].mxu1 }
 0x1d2   : > { %v854_v8 = vadd.f32 %v2365_v6, %v853_v7  ;;  %v2366_v9 = vpop.f32.mrb[18].mxu0 }
 0x1d3   : > { %v2367_v53 = vpop.f32.mrb[19].mxu0 }
 0x1d4   : > { %v2636_v12 = vpop.f32.mrb[10].mxu1  ;;  %v2368_v14 = vadd.f32 %v2367_v53, %v2366_v9  ;;  %v4360_v9 = vmul.f32 0.05103104, %v4292_v59 }
 0x1d5   : > { %v863_v15 = vpop.f32.mrb[11].mxu1 }
 0x1d6   : > { %v859_v16 = vadd.f32 %v2633_v5, %v2368_v14  ;;  %v2369_v17 = vpop.f32.mrb[20].mxu0  ;;  %v4363_v14 = vmul.f32 0.05103104, %v4296_v13  ;;  %v4376_v13 = vmul.f32 0.05103104, %v4298_v33 }
 0x1d7   : > { %v2370_v18 = vpop.f32.mrb[21].mxu0  ;;  %v4388_v33 = vmul.f32 0.05103104, %v4302_v52 }
 0x1d8   : > { %v2639_v20 = vpop.f32.mrb[12].mxu1  ;;  %v2991_v21 = vpack.c.bf16 %v859_v16, %v854_v8  ;;  %v2371_v25 = vadd.f32 %v2370_v18, %v2369_v17  ;;  %v3228_v28 = vpack.i.bf16 %v859_v16, %v854_v8 }
 0x1d9   : > { %v873_v29 = vpop.f32.mrb[13].mxu1 }
 0x1da   : > { %v4314_v30 = vadd.f32 %v2371_v25, %v863_v15  ;;  %v2372_v31 = vpop.f32.mrb[22].mxu0  ;;  %3229 = vrot.lane.b32.xlu1 %v3228_v28, %s3616_s4  ;;  %2993 = vmatprep.subr.msk.bf16.mxu0 %vm4310_vm1, %v2991_v21  ;;  %v4379_v28 = vmul.f32 0.05103104, %v4300_v43 }
 0x1db   : > { %v2373_v32 = vpop.f32.mrb[23].mxu0  ;;  %2996 = vmatpush3.bf16.xpose.msk.msra.mxu0 %vm4310_vm1, %v2991_v21 }
 0x1dc   : > { %v2642_v49 = vpop.f32.mrb[14].mxu1  ;;  %v2374_v22 = vadd.f32 %v2373_v32, %v2372_v31 }
 0x1dd   : > { %v883_v24 = vpop.f32.mrb[15].mxu1 }
 0x1de   : > { %v4321_v27 = vadd.f32 %v2636_v12, %v2374_v22  ;;  %v2375_v34 = vpop.f32.mrb[24].mxu0 }
 0x1df   : > { %v2376_v36 = vpop.f32.mrb[25].mxu0 }
 0x1e0   : > { %v2997_v37 = vpack.c.bf16 %v4321_v27, %v4314_v30  ;;  %v2377_v44 = vadd.f32 %v2376_v36, %v2375_v34  ;;  %v3233_v50 = vpack.i.bf16 %v4321_v27, %v4314_v30 }
 0x1e2   : > { %v4327_v51 = vadd.f32 %v2377_v44, %v873_v29  ;;  %v2378_v62 = vpop.f32.mrb[26].mxu0  ;;  %2999 = vmatprep.subr.msk.bf16.mxu0 %vm4310_vm1, %v2997_v37 }
 0x1e3   : > { %v2379_v0 = vpop.f32.mrb[27].mxu0  ;;  %3002 = vmatpush3.bf16.xpose.msk.msra.mxu0 %vm4310_vm1, %v2997_v37 }
 0x1e4   : > { %v2380_v1 = vadd.f32 %v2379_v0, %v2378_v62 }
 0x1e6   : > { %v4333_v10 = vadd.f32 %v2639_v20, %v2380_v1  ;;  %v2381_v11 = vpop.f32.mrb[28].mxu0 }
 0x1e7   : > { %v2382_v23 = vpop.f32.mrb[29].mxu0 }
 0x1e8   : > { %v3003_v26 = vpack.c.bf16 %v4333_v10, %v4327_v51  ;;  %v2383_v39 = vadd.f32 %v2382_v23, %v2381_v11  ;;  %v3238_v41 = vpack.i.bf16 %v4333_v10, %v4327_v51 }
 0x1ea   : > { %v4339_v56 = vadd.f32 %v2383_v39, %v883_v24  ;;  %v2384_v35 = vpop.f32.mrb[30].mxu0  ;;  %3005 = vmatprep.subr.msk.bf16.mxu0 %vm4310_vm1, %v3003_v26  ;;  %v4391_v24 = vmul.f32 0.05103104, %v4304_v58  ;;  %v4404_v58 = vmul.f32 0.05103104, %v4306_v2 }
 0x1eb   : > { %v2385_v38 = vpop.f32.mrb[31].mxu0  ;;  %3008 = vmatpush3.bf16.xpose.msk.msra.mxu0 %vm4310_vm1, %v3003_v26 }
 0x1ec   : > { %v2386_v40 = vadd.f32 %v2385_v38, %v2384_v35 }
 0x1ee   : > { %v4345_v42 = vadd.f32 %v2642_v49, %v2386_v40  ;;  %v2443_v45 = vpop.f32.mrb[32].mxu0 }
 0x1ef   : > { %v2444_v48 = vpop.f32.mrb[33].mxu0 }
 0x1f0   : > { %v3009_v46 = vpack.c.bf16 %v4345_v42, %v4339_v56  ;;  %v2677_v54 = vpop.f32.mrb[16].mxu1  ;;  %v3243_v55 = vpack.i.bf16 %v4345_v42, %v4339_v56  ;;  %v2445_v57 = vadd.f32 %v2444_v48, %v2443_v45 }
 0x1f1   : > { %v1111_v60 = vpop.f32.mrb[17].mxu1 }
 0x1f2   : > { %3011 = vmatprep.subr.msk.bf16.mxu0 %vm4310_vm1, %v3009_v46  ;;  %v2446_v61 = vpop.f32.mrb[34].mxu0  ;;  %v4355_v63 = vadd.f32 %v2445_v57, %v1111_v60 }
 0x1f3   : > { %3014 = vmatpush3.bf16.xpose.msk.msra.mxu0 %vm4310_vm1, %v3009_v46  ;;  %v2447_v3 = vpop.f32.mrb[35].mxu0 }
 0x1f4   : > { %v2680_v4 = vpop.f32.mrb[18].mxu1  ;;  %v2448_v5 = vadd.f32 %v2447_v3, %v2446_v61  ;;  %v1150_v3 = vlaneseq }
 0x1f5   : > { %v1121_v6 = vpop.f32.mrb[19].mxu1 }
 0x1f6   : > { %v2449_v7 = vpop.f32.mrb[36].mxu0  ;;  %v4357_v8 = vadd.f32 %v2677_v54, %v2448_v5 }
 0x1f7   : > { %v2450_v53 = vpop.f32.mrb[37].mxu0 }
 0x1f8   : > { %v2683_v12 = vpop.f32.mrb[20].mxu1  ;;  %v2451_v15 = vadd.f32 %v2450_v53, %v2449_v7  ;;  %v3248_v16 = vpack.i.bf16 %v4357_v8, %v4355_v63  ;;  %v3015_v17 = vpack.c.bf16 %v4357_v8, %v4355_v63 }
 0x1f9   : > { %v1131_v18 = vpop.f32.mrb[21].mxu1 }
 0x1fa   : > { %2704 = vmatmul.mubr.msk.f32.vlgmr.msra.gmra.mrb[48].mxu0 %vm1169_vm0, %v4360_v9  ;;  %v2452_v59 = vpop.f32.mrb[38].mxu0  ;;  %v4373_v20 = vadd.f32 %v2451_v15, %v1121_v6  ;;  %3016 = vmatprep.subr.bf16.mxu1 %v3015_v17  ;;  %v4432_v6 = vand.u32 127, %v1150_v3 }
 0x1fb   : > { %2706 = vmatprep.mubr.msk.f32.mxu0 %vm1169_vm0, %v4363_v14  ;;  %v2453_v21 = vpop.f32.mrb[39].mxu0  ;;  %3018 = vmatpush3.bf16.msra.mxu1 %v3015_v17 }
 0x1fc   : > { %v2686_v25 = vpop.f32.mrb[22].mxu1  ;;  %v2454_v29 = vadd.f32 %v2453_v21, %v2452_v59 }
 0x1fd   : > { %v1141_v31 = vpop.f32.mrb[23].mxu1 }
 0x1fe   : > { %2707 = vmatmul.mubr.msk.f32.gmra.mrb[50].mxu0 %vm1169_vm0, %v4376_v13  ;;  %v2455_v32 = vpop.f32.mrb[40].mxu0  ;;  %v4385_v49 = vadd.f32 %v2680_v4, %v2454_v29  ;;  %v4427_v4 = vshrl.u32 %v1150_v3, 7 }
 0x1ff   : > { %2709 = vmatprep.mubr.msk.f32.mxu0 %vm1169_vm0, %v4379_v28  ;;  %v2456_v22 = vpop.f32.mrb[41].mxu0 }
 0x200   : > { %v2457_v43 = vadd.f32 %v2456_v22, %v2455_v32  ;;  %v3253_v34 = vpack.i.bf16 %v4385_v49, %v4373_v20  ;;  %v3019_v36 = vpack.c.bf16 %v4385_v49, %v4373_v20  ;;  %v4430_v5 = vadd.s32 8, %v4427_v4 }
 0x201   : > { %v4437_v7 = vadd.s32 24, %v4427_v4  ;;  %vm1161_vm3 = vcmp.le.s32.totalorder %v4432_v6, %v4427_v4  ;;  %v4454_v21 = vadd.s32 32, %v4427_v4  ;;  %v4459_v29 = vadd.s32 40, %v4427_v4 }
 0x202   : > { %2710 = vmatmul.mubr.msk.f32.gmra.mrb[52].mxu0 %vm1169_vm0, %v4388_v33  ;;  %v2458_v37 = vpop.f32.mrb[42].mxu0  ;;  %v4401_v52 = vadd.f32 %v2457_v43, %v1131_v18  ;;  %3020 = vmatprep.subr.bf16.mxu1 %v3019_v36  ;;  %vm1162_vm2 = vcmp.le.s32.totalorder %v4432_v6, %v4430_v5 }
 0x203   : > { %2712 = vmatprep.mubr.msk.f32.mxu0 %vm1169_vm0, %v4391_v24  ;;  %v2459_v44 = vpop.f32.mrb[43].mxu0  ;;  %3022 = vmatpush3.bf16.msra.mxu1 %v3019_v36  ;;  %vm1164_vm4 = vcmp.le.s32.totalorder %v4432_v6, %v4437_v7  ;;  %v4467_v36 = vadd.s32 56, %v4427_v4  ;;  %vm1165_vm6 = vcmp.le.s32.totalorder %v4432_v6, %v4454_v21  ;;  %vm1166_vm7 = vcmp.le.s32.totalorder %v4432_v6, %v4459_v29 }
 0x204   : > { %v2460_v62 = vadd.f32 %v2459_v44, %v2458_v37 }
 0x205   : > { %vm1168_vm8 = vcmp.le.s32.totalorder %v4432_v6, %v4467_v36 }
 0x206   : > { %2713 = vmatmul.mubr.msk.f32.gmra.mrb[54].mxu0 %vm1169_vm0, %v4404_v58  ;;  %v2461_v0 = vpop.f32.mrb[44].mxu0  ;;  %v4408_v1 = vadd.f32 %v2683_v12, %v2460_v62  ;;  %v4442_v12 = vadd.s32 16, %v4427_v4 }
 0x207   : > { %v2462_v11 = vpop.f32.mrb[45].mxu0 }
 0x208   : > { %v2463_v23 = vadd.f32 %v2462_v11, %v2461_v0  ;;  %v3258_v26 = vpack.i.bf16 %v4408_v1, %v4401_v52  ;;  %v3023_v39 = vpack.c.bf16 %v4408_v1, %v4401_v52  ;;  %vm1163_vm5 = vcmp.le.s32.totalorder %v4432_v6, %v4442_v12 }
 0x209   : > { %v4477_v0 = vadd.s32 48, %v4427_v4 }
 0x20a   : > { %v2464_v35 = vpop.f32.mrb[46].mxu0  ;;  %v4414_v2 = vadd.f32 %v2463_v23, %v1141_v31  ;;  %3024 = vmatprep.subr.bf16.mxu1 %v3023_v39 }
 0x20b   : > { %v2465_v38 = vpop.f32.mrb[47].mxu0  ;;  %3026 = vmatpush3.bf16.msra.mxu1 %v3023_v39  ;;  %vm1167_vm9 = vcmp.le.s32.totalorder %v4432_v6, %v4477_v0 }
 0x20c   : > { %v2466_v40 = vadd.f32 %v2465_v38, %v2464_v35 }
 0x20e   : > { %v4416_v45 = vadd.f32 %v2686_v25, %v2466_v40 }
 0x210   : > { %v3263_v46 = vpack.i.bf16 %v4416_v45, %v4414_v2  ;;  %v3027_v48 = vpack.c.bf16 %v4416_v45, %v4414_v2 }
 0x212   : > { %3028 = vmatprep.subr.bf16.mxu1 %v3027_v48 }
 0x213   : > { %3030 = vmatpush3.bf16.msra.mxu1 %v3027_v48 }
 0x24c   : > { %v3230_v54 = vpop.permute.xlu1 %3229 }
 0x24d   : > { %v3232_v57 = vunpack.i.h.bf16 %v3230_v54  ;;  %v3231_v60 = vunpack.i.l.bf16 %v3230_v54 }
 0x24f   : > { %v4422_v61 = vpack.c.bf16 %v3232_v57, %v3231_v60 }
 0x251   : > { %3033 = vmatprep.subr.msk.bf16.mxu1 %vm4310_vm1, %v4422_v61 }
 0x2cd   : > { %v2705_v53 = vpop.f32.mrb[48].mxu0 }
 0x2ce   : > { %v1324_v15 = vsel %vm1162_vm2, %v2705_v53, -inf  ;;  %v1284_v17 = vpop.f32.mrb[49].mxu0 }
 0x2cf   : > { %v1334_v18 = vsel %vm1169_vm0, %v1324_v15, -inf  ;;  %v1323_v59 = vsel %vm1161_vm3, %v1284_v17, -inf }
 0x2d0   : > { %1335 = vmax.xlane.f32.xlu0 %v1334_v18  ;;  %v1331_v22 = vsel %vm1169_vm0, %v1323_v59, -inf }
 0x2d1   : > { %v2708_v25 = vpop.f32.mrb[50].mxu0 }
 0x2d2   : > { %v1326_v31 = vsel %vm1164_vm4, %v2708_v25, -inf  ;;  %v1294_v32 = vpop.f32.mrb[51].mxu0 }
 0x2d3   : > { %v1340_v43 = vsel %vm1169_vm0, %v1326_v31, -inf  ;;  %v1325_v37 = vsel %vm1163_vm5, %v1294_v32, -inf }
 0x2d4   : > { %1332 = vmax.xlane.f32.xlu0 %v1331_v22  ;;  %1341 = vmax.xlane.f32.xlu1 %v1340_v43  ;;  %v1337_v23 = vsel %vm1169_vm0, %v1325_v37, -inf }
 0x2d5   : > { %v2711_v44 = vpop.f32.mrb[52].mxu0 }
 0x2d6   : > { %v1304_v62 = vpop.f32.mrb[53].mxu0  ;;  %v1328_v39 = vsel %vm1166_vm7, %v2711_v44, -inf }
 0x2d7   : > { %v1327_v11 = vsel %vm1165_vm6, %v1304_v62, -inf  ;;  %v1346_v54 = vsel %vm1169_vm0, %v1328_v39, -inf }
 0x2d8   : > { %1338 = vmax.xlane.f32.xlu1 %v1337_v23  ;;  %v1343_v35 = vsel %vm1169_vm0, %v1327_v11, -inf }
 0x2d9   : > { %1344 = vmax.xlane.f32.xlu0 %v1343_v35  ;;  %v2714_v38 = vpop.f32.mrb[54].mxu0 }
 0x2da   : > { %v1330_v40 = vsel %vm1168_vm8, %v2714_v38, -inf  ;;  %v1314_v48 = vpop.f32.mrb[55].mxu0 }
 0x2db   : > { %v1352_v57 = vsel %vm1169_vm0, %v1330_v40, -inf  ;;  %v1329_v60 = vsel %vm1167_vm9, %v1314_v48, -inf }
 0x2dc   : > { %1347 = vmax.xlane.f32.xlu1 %v1346_v54  ;;  %v1349_v3 = vsel %vm1169_vm0, %v1329_v60, -inf }
 0x2dd   : > { %1353 = vmax.xlane.f32.xlu0 %v1352_v57 }
 0x2e1   : > { %1350 = vmax.xlane.f32.xlu0 %v1349_v3 }
 0x2ed   : > { %3239 = vrot.lane.b32.xlu1 %v3238_v41, %s3616_s4 }
 0x2f1   : > { %3244 = vrot.lane.b32.xlu1 %v3243_v55, %s3616_s4 }
 0x2f5   : > { %1548 = vrot.lane.b32.xlu1 %v4290_v47, %s3616_s4 }
 0x2f7   : > { %3234 = vrot.lane.b32.xlu0 %v3233_v50, %s3616_s4 }
 0x2f9   : > { %1550 = vrot.lane.b32.xlu1 %v4360_v9, %s3616_s4 }
 0x2fb   : > { %1552 = vrot.lane.b32.xlu0 %v4363_v14, %s3616_s4 }
 0x2fd   : > { %1554 = vrot.lane.b32.xlu1 %v4376_v13, %s3616_s4 }
 0x2ff   : > { %1556 = vrot.lane.b32.xlu0 %v4379_v28, %s3616_s4 }
 0x301   : > { %1558 = vrot.lane.b32.xlu1 %v4388_v33, %s3616_s4 }
 0x303   : > { %1560 = vrot.lane.b32.xlu0 %v4391_v24, %s3616_s4 }
 0x305   : > { %1562 = vrot.lane.b32.xlu1 %v4404_v58, %s3616_s4 }
 0x309   : > { %3249 = vrot.lane.b32.xlu1 %v3248_v16, %s3616_s4 }
 0x35d   : > { %v1336_v47 = vpop.xlane.xlu0 %1335 }
 0x35e   : > { %v1356_v30 = vsub.f32 %v1324_v15, %v1336_v47 }
 0x360   : > { %v1365_v41 = vmul.f32 1.442695, %v1356_v30 }
 0x361   : > { %v1333_v27 = vpop.xlane.xlu0 %1332  ;;  %v1342_v50 = vpop.xlane.xlu1 %1341 }
 0x362   : > { %v1355_v51 = vsub.f32 %v1323_v59, %v1333_v27  ;;  %v1358_v10 = vsub.f32 %v1326_v31, %v1342_v50 }
 0x364   : > { %v1363_v56 = vmul.f32 1.442695, %v1355_v51  ;;  %v1369_v42 = vmul.f32 1.442695, %v1358_v10 }
 0x365   : > { %v1339_v55 = vpop.xlane.xlu1 %1338 }
 0x366   : > { %3268 = vpow2.f32 %v1363_v56  ;;  %v1357_v9 = vsub.f32 %v1325_v37, %v1339_v55  ;;  %v1345_v14 = vpop.xlane.xlu0 %1344 }
 0x367   : > { %3270 = vpow2.f32 %v1365_v41  ;;  %v1359_v13 = vsub.f32 %v1327_v11, %v1345_v14 }
 0x368   : > { %v1367_v28 = vmul.f32 1.442695, %v1357_v9  ;;  %3272 = vpow2.f32 %v1369_v42 }
 0x369   : > { %v1371_v33 = vmul.f32 1.442695, %v1359_v13  ;;  %v1348_v63 = vpop.xlane.xlu1 %1347 }
 0x36a   : > { %3274 = vpow2.f32 %v1367_v28  ;;  %v1360_v8 = vsub.f32 %v1328_v39, %v1348_v63  ;;  %v1354_v16 = vpop.xlane.xlu0 %1353 }
 0x36b   : > { %3276 = vpow2.f32 %v1371_v33  ;;  %v1362_v58 = vsub.f32 %v1330_v40, %v1354_v16 }
 0x36c   : > { %v1373_v24 = vmul.f32 1.442695, %v1360_v8 }
 0x36d   : > { %v3240_v53 = vpop.permute.xlu1 %3239  ;;  %v1377_v59 = vmul.f32 1.442695, %v1362_v58 }
 0x36e   : > { %3278 = vpow2.f32 %v1373_v24  ;;  %v1351_v15 = vpop.xlane.xlu0 %1350  ;;  %v3242_v35 = vunpack.i.h.bf16 %v3240_v53  ;;  %v3241_v38 = vunpack.i.l.bf16 %v3240_v53 }
 0x36f   : > { %v1361_v17 = vsub.f32 %v1329_v60, %v1351_v15 }
 0x370   : > { %v4532_v18 = vpop.eup %3268  ;;  %v3043_v48 = vpack.c.bf16 %v3242_v35, %v3241_v38 }
 0x371   : > { %v4534_v25 = vpop.eup %3270  ;;  %v1375_v31 = vmul.f32 1.442695, %v1361_v17  ;;  %2731 = vmatprep.mubr.msk.f32.mxu1 %vm1169_vm0, %v4532_v18  ;;  %v3245_v32 = vpop.permute.xlu1 %3244 }
 0x372   : > { %2732 = vmatmul.mubr.msk.f32.vlgmr.msra.gmra.mrb[24].mxu1 %vm1169_vm0, %v4534_v25  ;;  %v3235_v22 = vpop.permute.xlu0 %3234  ;;  %v4540_v43 = vpop.eup %3272  ;;  %v3247_v3 = vunpack.i.h.bf16 %v3245_v32  ;;  %v3246_v47 = vunpack.i.l.bf16 %v3245_v32 }
 0x373   : > { %3280 = vpow2.f32 %v1375_v31  ;;  %3036 = vmatpush3.bf16.xpose.msk.msra.mxu1 %vm4310_vm1, %v4422_v61  ;;  %v3237_v37 = vunpack.i.h.bf16 %v3235_v22  ;;  %v3236_v44 = vunpack.i.l.bf16 %v3235_v22 }
 0x374   : > { %v4545_v62 = vpop.eup %3274  ;;  %3282 = vpow2.f32 %v1377_v59  ;;  %v3049_v27 = vpack.c.bf16 %v3247_v3, %v3246_v47 }
 0x375   : > { %v4547_v11 = vpop.eup %3276  ;;  %v3037_v23 = vpack.c.bf16 %v3237_v37, %v3236_v44  ;;  %2734 = vmatprep.mubr.msk.f32.mxu1 %vm1169_vm0, %v4545_v62  ;;  %v1549_v39 = vpop.permute.xlu1 %1548 }
 0x376   : > { %2735 = vmatmul.mubr.msk.f32.gmra.mrb[26].mxu1 %vm1169_vm0, %v4540_v43  ;;  %v1553_v42 = vpop.permute.xlu0 %1552 }
 0x377   : > { %2737 = vmatprep.mubr.msk.f32.mxu1 %vm1169_vm0, %v4547_v11  ;;  %3039 = vmatprep.subr.msk.bf16.mxu1 %vm4310_vm1, %v3037_v23 }
 0x378   : > { %v4557_v61 = vpop.eup %3278 }
 0x379   : > { %v1551_v40 = vpop.permute.xlu1 %1550 }
 0x37a   : > { %2738 = vmatmul.mubr.msk.f32.gmra.mrb[28].mxu1 %vm1169_vm0, %v4557_v61  ;;  %v1557_v55 = vpop.permute.xlu0 %1556 }
 0x37b   : > { %3042 = vmatpush3.bf16.xpose.msk.msra.mxu1 %vm4310_vm1, %v3037_v23 }
 0x37c   : > { %3045 = vmatprep.subr.msk.bf16.mxu1 %vm4310_vm1, %v3043_v48 }
 0x37d   : > { %v4565_v54 = vpop.eup %3280  ;;  %v1555_v57 = vpop.permute.xlu1 %1554 }
 0x37e   : > { %v4567_v60 = vpop.eup %3282  ;;  %2740 = vmatprep.mubr.msk.f32.mxu1 %vm1169_vm0, %v4565_v54  ;;  %v1561_v9 = vpop.permute.xlu0 %1560 }
 0x37f   : > { %2741 = vmatmul.mubr.msk.f32.gmra.mrb[30].mxu1 %vm1169_vm0, %v4567_v60 }
 0x380   : > { %2759 = vmatprep.mubr.msk.f32.mxu1 %vm1169_vm0, %v1549_v39 }
 0x381   : > { %v1559_v30 = vpop.permute.xlu1 %1558 }
 0x383   : > { %3048 = vmatpush3.bf16.xpose.msk.msra.mxu1 %vm4310_vm1, %v3043_v48 }
 0x384   : > { %3051 = vmatprep.subr.msk.bf16.mxu1 %vm4310_vm1, %v3049_v27 }
 0x385   : > { %v1563_v50 = vpop.permute.xlu1 %1562 }
 0x389   : > { %v3250_v51 = vpop.permute.xlu1 %3249 }
 0x38a   : > { %v3252_v10 = vunpack.i.h.bf16 %v3250_v51  ;;  %v3251_v41 = vunpack.i.l.bf16 %v3250_v51 }
 0x38b   : > { %3054 = vmatpush3.bf16.xpose.msk.msra.mxu1 %vm4310_vm1, %v3049_v27 }
 0x38c   : > { %v3055_v56 = vpack.c.bf16 %v3252_v10, %v3251_v41 }
 0x38e   : > { %3056 = vmatprep.subr.bf16.mxu0 %v3055_v56 }
 0x38f   : > { %3058 = vmatpush3.bf16.msra.mxu0 %v3055_v56 }
 0x392   : > { %2760 = vmatmul.mubr.msk.f32.vlgmr.msra.gmra.mrb[32].mxu1 %vm1169_vm0, %v1551_v40 }
 0x393   : > { %2762 = vmatprep.mubr.msk.f32.mxu1 %vm1169_vm0, %v1553_v42 }
 0x396   : > { %2763 = vmatmul.mubr.msk.f32.gmra.mrb[34].mxu1 %vm1169_vm0, %v1555_v57 }
 0x397   : > { %2765 = vmatprep.mubr.msk.f32.mxu1 %vm1169_vm0, %v1557_v55 }
 0x39a   : > { %2766 = vmatmul.mubr.msk.f32.gmra.mrb[36].mxu1 %vm1169_vm0, %v1559_v30 }
 0x39b   : > { %2768 = vmatprep.mubr.msk.f32.mxu1 %vm1169_vm0, %v1561_v9 }
 0x39e   : > { %2769 = vmatmul.mubr.msk.f32.gmra.mrb[38].mxu1 %vm1169_vm0, %v1563_v50 }
 0x445   : > { %v4587_v19 = vpop.f32.mrb[24].mxu1 }
 0x446   : > { %v4589_v14 = vpop.f32.mrb[25].mxu1 }
 0x449   : > { %v4591_v13 = vpop.f32.mrb[26].mxu1 }
 0x44a   : > { %v4593_v28 = vpop.f32.mrb[27].mxu1 }
 0x44d   : > { %v4595_v33 = vpop.f32.mrb[28].mxu1 }
 0x44e   : > { %v4597_v63 = vpop.f32.mrb[29].mxu1 }
 0x452   : > { %v4599_v8 = vpop.f32.mrb[30].mxu1 }
 0x453   : > { %v4601_v16 = vpop.f32.mrb[31].mxu1 }
 0x465   : > { %v2761_v24 = vpop.f32.mrb[32].mxu1 }
 0x466   : > { %v1718_v58 = vsel %vm1162_vm2, %v2761_v24, -inf  ;;  %v1678_v53 = vpop.f32.mrb[33].mxu1 }
 0x467   : > { %v1717_v15 = vsel %vm1161_vm3, %v1678_v53, -inf  ;;  %v1728_v17 = vsel %vm1169_vm0, %v1718_v58, -inf }
 0x468   : > { %1729 = vmax.xlane.f32.xlu1 %v1728_v17  ;;  %v1725_v59 = vsel %vm1169_vm0, %v1717_v15, -inf }
 0x469   : > { %1726 = vmax.xlane.f32.xlu0 %v1725_v59  ;;  %v2764_v31 = vpop.f32.mrb[34].mxu1 }
 0x46a   : > { %v1720_v32 = vsel %vm1164_vm4, %v2764_v31, -inf  ;;  %v1688_v22 = vpop.f32.mrb[35].mxu1 }
 0x46b   : > { %v1734_v5 = vsel %vm1169_vm0, %v1720_v32, -inf  ;;  %v1719_v37 = vsel %vm1163_vm5, %v1688_v22, -inf }
 0x46c   : > { %v1731_v7 = vsel %vm1169_vm0, %v1719_v37, -inf }
 0x46d   : > { %1735 = vmax.xlane.f32.xlu0 %v1734_v5  ;;  %v2767_v4 = vpop.f32.mrb[36].mxu1 }
 0x46e   : > { %v1722_v44 = vsel %vm1166_vm7, %v2767_v4, -inf  ;;  %v1698_v23 = vpop.f32.mrb[37].mxu1 }
 0x46f   : > { %v1740_v39 = vsel %vm1169_vm0, %v1722_v44, -inf  ;;  %v1721_v35 = vsel %vm1165_vm6, %v1698_v23, -inf }
 0x470   : > { %1741 = vmax.xlane.f32.xlu1 %v1740_v39  ;;  %v1737_v40 = vsel %vm1169_vm0, %v1721_v35, -inf }
 0x471   : > { %1732 = vmax.xlane.f32.xlu0 %v1731_v7  ;;  %v2770_v38 = vpop.f32.mrb[38].mxu1 }
 0x472   : > { %v1708_v12 = vpop.f32.mrb[39].mxu1  ;;  %v1724_v29 = vsel %vm1168_vm8, %v2770_v38, -inf }
 0x473   : > { %v1746_v48 = vsel %vm1169_vm0, %v1724_v29, -inf  ;;  %v1723_v57 = vsel %vm1167_vm9, %v1708_v12, -inf }
 0x474   : > { %v1743_v21 = vsel %vm1169_vm0, %v1723_v57, -inf }
 0x475   : > { %1738 = vmax.xlane.f32.xlu0 %v1737_v40 }
 0x479   : > { %1747 = vmax.xlane.f32.xlu0 %v1746_v48 }
 0x47d   : > { %1744 = vmax.xlane.f32.xlu0 %v1743_v21 }
 0x481   : > { %3259 = vrot.lane.b32.xlu1 %v3258_v26, %s3616_s4 }
 0x485   : > { %3264 = vrot.lane.b32.xlu1 %v3263_v46, %s3616_s4 }
 0x493   : > { %3254 = vrot.lane.b32.xlu0 %v3253_v34, %s3616_s4 }
 0x4f5   : > { %v1730_v6 = vpop.xlane.xlu1 %1729 }
 0x4f6   : > { %v1750_v36 = vsub.f32 %v1718_v58, %v1730_v6  ;;  %v1727_v0 = vpop.xlane.xlu0 %1726 }
 0x4f7   : > { %v1749_v3 = vsub.f32 %v1717_v15, %v1727_v0 }
 0x4f8   : > { %v1759_v47 = vmul.f32 1.442695, %v1750_v36 }
 0x4f9   : > { %v1757_v30 = vmul.f32 1.442695, %v1749_v3  ;;  %v1382_v3 = vsel %vm1169_vm0, %v4534_v25, 0.0  ;;  %v1394_v25 = vsel %vm1169_vm0, %v4557_v61, 0.0 }
 0x4fa   : > { %3284 = vpow2.f32 %v1759_v47  ;;  %v1736_v27 = vpop.xlane.xlu0 %1735 }
 0x4fb   : > { %3286 = vpow2.f32 %v1757_v30  ;;  %v1752_v52 = vsub.f32 %v1720_v32, %v1736_v27  ;;  %v1388_v30 = vsel %vm1169_vm0, %v4540_v43, 0.0  ;;  %v1379_v27 = vsel %vm1169_vm0, %v4532_v18, 0.0 }
 0x4fc   : > { %v1400_v18 = vsel %vm1169_vm0, %v4567_v60, 0.0  ;;  %v1391_v43 = vsel %vm1169_vm0, %v4547_v11, 0.0 }
 0x4fd   : > { %v1763_v1 = vmul.f32 1.442695, %v1752_v52  ;;  %v1742_v26 = vpop.xlane.xlu1 %1741  ;;  %v1385_v52 = vsel %vm1169_vm0, %v4545_v62, 0.0  ;;  %v1397_v62 = vsel %vm1169_vm0, %v4565_v54, 0.0 }
 0x4fe   : > { %v1754_v50 = vsub.f32 %v1722_v44, %v1742_v26  ;;  %v1733_v2 = vpop.xlane.xlu0 %1732 }
 0x4ff   : > { %3288 = vpow2.f32 %v1763_v1  ;;  %v1751_v45 = vsub.f32 %v1719_v37, %v1733_v2 }
 0x500   : > { %v1767_v46 = vmul.f32 1.442695, %v1754_v50 }
 0x501   : > { %v1761_v51 = vmul.f32 1.442695, %v1751_v45  ;;  %v3260_v53 = vpop.permute.xlu1 %3259 }
 0x502   : > { %3290 = vpow2.f32 %v1767_v46  ;;  %v1739_v20 = vpop.xlane.xlu0 %1738  ;;  %v3262_v37 = vunpack.i.h.bf16 %v3260_v53  ;;  %v3261_v23 = vunpack.i.l.bf16 %v3260_v53 }
 0x503   : > { %3292 = vpow2.f32 %v1761_v51  ;;  %v1753_v49 = vsub.f32 %v1721_v35, %v1739_v20 }
 0x504   : > { %v3285_v34 = vpop.eup %3284 }
 0x505   : > { %v3287_v10 = vpop.eup %3286  ;;  %v1765_v41 = vmul.f32 1.442695, %v1753_v49  ;;  %v1776_v56 = vsel %vm1169_vm0, %v3285_v34, 0.0  ;;  %v3265_v35 = vpop.permute.xlu1 %3264 }
 0x506   : > { %2787 = vmatprep.mubr.msk.f32.mxu0 %vm1169_vm0, %v3287_v10  ;;  %v1748_v42 = vpop.xlane.xlu0 %1747  ;;  %1777 = vadd.xlane.f32.xlu0 %v1776_v56  ;;  %v1773_v55 = vsel %vm1169_vm0, %v3287_v10, 0.0  ;;  %v3267_v48 = vunpack.i.h.bf16 %v3265_v35 }
 0x507   : > { %3294 = vpow2.f32 %v1765_v41  ;;  %v1756_v9 = vsub.f32 %v1724_v29, %v1748_v42  ;;  %1774 = vadd.xlane.f32.xlu1 %v1773_v55  ;;  %v3063_v29 = vpack.c.bf16 %v3262_v37, %v3261_v23 }
 0x509   : > { %v3289_v24 = vpop.eup %3288  ;;  %v1771_v58 = vmul.f32 1.442695, %v1756_v9 }
 0x50a   : > { %v1745_v15 = vpop.xlane.xlu0 %1744  ;;  %v1782_v17 = vsel %vm1169_vm0, %v3289_v24, 0.0 }
 0x50b   : > { %3296 = vpow2.f32 %v1771_v58  ;;  %v1755_v59 = vsub.f32 %v1723_v57, %v1745_v15  ;;  %1783 = vadd.xlane.f32.xlu1 %v1782_v17  ;;  %v3266_v57 = vunpack.i.l.bf16 %v3265_v35 }
 0x50c   : > { %v3291_v31 = vpop.eup %3290 }
 0x50d   : > { %v3293_v32 = vpop.eup %3292  ;;  %v1769_v22 = vmul.f32 1.442695, %v1755_v59  ;;  %v1788_v5 = vsel %vm1169_vm0, %v3291_v31, 0.0  ;;  %v3067_v36 = vpack.c.bf16 %v3267_v48, %v3266_v57 }
 0x50e   : > { %v3255_v4 = vpop.permute.xlu0 %3254  ;;  %v1779_v44 = vsel %vm1169_vm0, %v3293_v32, 0.0 }
 0x50f   : > { %3298 = vpow2.f32 %v1769_v22  ;;  %v3257_v39 = vunpack.i.h.bf16 %v3255_v4  ;;  %v3256_v7 = vunpack.i.l.bf16 %v3255_v4  ;;  %1789 = vadd.xlane.f32.xlu1 %v1788_v5  ;;  %1780 = vadd.xlane.f32.xlu0 %v1779_v44 }
 0x511   : > { %v3295_v38 = vpop.eup %3294  ;;  %v3059_v12 = vpack.c.bf16 %v3257_v39, %v3256_v7 }
 0x512   : > { %v1785_v40 = vsel %vm1169_vm0, %v3295_v38, 0.0 }
 0x513   : > { %1786 = vadd.xlane.f32.xlu0 %v1785_v40  ;;  %3060 = vmatprep.subr.bf16.mxu0 %v3059_v12 }
 0x514   : > { %3062 = vmatpush3.bf16.msra.mxu0 %v3059_v12 }
 0x515   : > { %v3297_v21 = vpop.eup %3296  ;;  %3064 = vmatprep.subr.bf16.mxu0 %v3063_v29 }
 0x516   : > { %v1794_v6 = vsel %vm1169_vm0, %v3297_v21, 0.0 }
 0x517   : > { %1795 = vadd.xlane.f32.xlu1 %v1794_v6 }
 0x518   : > { %3066 = vmatpush3.bf16.msra.mxu0 %v3063_v29 }
 0x519   : > { %v3299_v0 = vpop.eup %3298  ;;  %3068 = vmatprep.subr.bf16.mxu0 %v3067_v36 }
 0x51a   : > { %v1791_v47 = vsel %vm1169_vm0, %v3299_v0, 0.0 }
 0x51b   : > { %1383 = vadd.xlane.f32.xlu1 %v1382_v3  ;;  %1792 = vadd.xlane.f32.xlu0 %v1791_v47 }
 0x51c   : > { %3070 = vmatpush3.bf16.msra.mxu0 %v3067_v36 }
 0x51f   : > { %1389 = vadd.xlane.f32.xlu1 %v1388_v30  ;;  %1380 = vadd.xlane.f32.xlu0 %v1379_v27 }
 0x520   : > { %2788 = vmatmul.mubr.msk.f32.vlgmr.msra.gmra.mrb[56].mxu0 %vm1169_vm0, %v3285_v34 }
 0x521   : > { %2790 = vmatprep.mubr.msk.f32.mxu0 %vm1169_vm0, %v3293_v32 }
 0x523   : > { %1395 = vadd.xlane.f32.xlu1 %v1394_v25  ;;  %1386 = vadd.xlane.f32.xlu0 %v1385_v52 }
 0x524   : > { %2791 = vmatmul.mubr.msk.f32.gmra.mrb[58].mxu0 %vm1169_vm0, %v3289_v24 }
 0x525   : > { %2793 = vmatprep.mubr.msk.f32.mxu0 %vm1169_vm0, %v3295_v38 }
 0x527   : > { %1401 = vadd.xlane.f32.xlu1 %v1400_v18  ;;  %1392 = vadd.xlane.f32.xlu0 %v1391_v43 }
 0x528   : > { %2794 = vmatmul.mubr.msk.f32.gmra.mrb[60].mxu0 %vm1169_vm0, %v3291_v31 }
 0x529   : > { %2796 = vmatprep.mubr.msk.f32.mxu0 %vm1169_vm0, %v3299_v0 }
 0x52b   : > { %1398 = vadd.xlane.f32.xlu0 %v1397_v62 }
 0x52c   : > { %2797 = vmatmul.mubr.msk.f32.gmra.mrb[62].mxu0 %vm1169_vm0, %v3297_v21 }
 0x593   : > { %v1778_v1 = vpop.xlane.xlu0 %1777 }
 0x594   : > { %v1775_v61 = vpop.xlane.xlu1 %1774  ;;  %3300 = vrcp.f32 %v1778_v1 }
 0x595   : > { %3302 = vrcp.f32 %v1775_v61 }
 0x598   : > { %v1784_v60 = vpop.xlane.xlu1 %1783 }
 0x599   : > { %3304 = vrcp.f32 %v1784_v60 }
 0x59c   : > { %v1781_v26 = vpop.xlane.xlu0 %1780  ;;  %v1790_v50 = vpop.xlane.xlu1 %1789 }
 0x59d   : > { %3306 = vrcp.f32 %v1781_v26 }
 0x59e   : > { %v3301_v2 = vpop.eup %3300 }
 0x59f   : > { %v3303_v51 = vpop.eup %3302 }
 0x5a0   : > { %v1787_v11 = vpop.xlane.xlu0 %1786 }
 0x5a1   : > { %3308 = vrcp.f32 %v1787_v11 }
 0x5a2   : > { %3310 = vrcp.f32 %v1790_v50 }
 0x5a3   : > { %v3305_v10 = vpop.eup %3304 }
 0x5a4   : > { %v1796_v34 = vpop.xlane.xlu1 %1795 }
 0x5a7   : > { %v3307_v55 = vpop.eup %3306 }
 0x5a8   : > { %v1793_v45 = vpop.xlane.xlu0 %1792  ;;  %v1384_v44 = vpop.xlane.xlu1 %1383 }
 0x5a9   : > { %3312 = vrcp.f32 %v1793_v45 }
 0x5aa   : > { %3314 = vrcp.f32 %v1796_v34 }
 0x5ab   : > { %v3309_v24 = vpop.eup %3308  ;;  %3316 = vrcp.f32 %v1384_v44 }
 0x5ac   : > { %v3311_v17 = vpop.eup %3310  ;;  %v1381_v23 = vpop.xlane.xlu0 %1380 }
 0x5ad   : > { %v1390_v39 = vpop.xlane.xlu1 %1389  ;;  %3318 = vrcp.f32 %v1381_v23 }
 0x5ae   : > { %3320 = vrcp.f32 %v1390_v39 }
 0x5b0   : > { %v1387_v7 = vpop.xlane.xlu0 %1386 }
 0x5b1   : > { %v1396_v35 = vpop.xlane.xlu1 %1395  ;;  %3322 = vrcp.f32 %v1387_v7 }
 0x5b3   : > { %v3313_v31 = vpop.eup %3312 }
 0x5b4   : > { %v3315_v37 = vpop.eup %3314  ;;  %v1393_v38 = vpop.xlane.xlu0 %1392 }
 0x5b5   : > { %3324 = vrcp.f32 %v1393_v38  ;;  %v3317_v12 = vpop.eup %3316  ;;  %v1402_v40 = vpop.xlane.xlu1 %1401 }
 0x5b6   : > { %3326 = vrcp.f32 %v1396_v35  ;;  %v1541_v57 = vmul.f32 %v3317_v12, %v4587_v19 }
 0x5b7   : > { %v3319_v48 = vpop.eup %3318 }
 0x5b8   : > { %v1399_v29 = vpop.xlane.xlu0 %1398  ;;  %v3321_v21 = vpop.eup %3320  ;;  %v1540_v36 = vmul.f32 %v3319_v48, %v4589_v14 }
 0x5b9   : > { %3328 = vrcp.f32 %v1399_v29  ;;  %v1543_v19 = vmul.f32 %v3321_v21, %v4591_v13 }
 0x5ba   : > { %3330 = vrcp.f32 %v1402_v40 }
 0x5bb   : > { %v3323_v30 = vpop.eup %3322 }
 0x5bc   : > { %v1542_v52 = vmul.f32 %v3323_v30, %v4593_v28 }
 0x5bf   : > { %v3325_v27 = vpop.eup %3324 }
 0x5c0   : > { %v3327_v18 = vpop.eup %3326  ;;  %v1544_v62 = vmul.f32 %v3325_v27, %v4597_v63 }
 0x5c1   : > { %v1545_v60 = vmul.f32 %v3327_v18, %v4595_v33 }
 0x5c3   : > { %v3329_v61 = vpop.eup %3328 }
 0x5c4   : > { %v3331_v28 = vpop.eup %3330  ;;  %v1546_v63 = vmul.f32 %v3329_v61, %v4601_v16 }
 0x5c5   : > { %v1547_v33 = vmul.f32 %v3331_v28, %v4599_v8 }
 0x5f3   : > { %v2789_v46 = vpop.f32.mrb[56].mxu0 }
 0x5f4   : > { %v1967_v20 = vmul.f32 %v3301_v2, %v2789_v46  ;;  %v1919_v54 = vpop.f32.mrb[57].mxu0 }
 0x5f5   : > { %v1966_v49 = vmul.f32 %v3303_v51, %v1919_v54 }
 0x5f6   : > { %1984 = vrot.lane.b32.xlu1 %v1967_v20, %s3616_s4 }
 0x5f7   : > { %1982 = vrot.lane.b32.xlu0 %v1966_v49, %s3616_s4  ;;  %v2792_v41 = vpop.f32.mrb[58].mxu0 }
 0x5f8   : > { %v1969_v56 = vmul.f32 %v3305_v10, %v2792_v41  ;;  %v1929_v42 = vpop.f32.mrb[59].mxu0 }
 0x5f9   : > { %v1968_v58 = vmul.f32 %v3307_v55, %v1929_v42 }
 0x5fa   : > { %1988 = vrot.lane.b32.xlu1 %v1969_v56, %s3616_s4 }
 0x5fb   : > { %v2795_v9 = vpop.f32.mrb[60].mxu0 }
 0x5fc   : > { %v1939_v53 = vpop.f32.mrb[61].mxu0  ;;  %v1971_v32 = vmul.f32 %v3311_v17, %v2795_v9 }
 0x5fd   : > { %v1970_v15 = vmul.f32 %v3309_v24, %v1939_v53 }
 0x5fe   : > { %1986 = vrot.lane.b32.xlu1 %v1968_v58, %s3616_s4 }
 0x5ff   : > { %1990 = vrot.lane.b32.xlu0 %v1970_v15, %s3616_s4  ;;  %v2798_v59 = vpop.f32.mrb[62].mxu0 }
 0x600   : > { %v1949_v22 = vpop.f32.mrb[63].mxu0  ;;  %v1973_v4 = vmul.f32 %v3315_v37, %v2798_v59 }
 0x601   : > { %v1972_v5 = vmul.f32 %v3313_v31, %v1949_v22 }
 0x602   : > { %1992 = vrot.lane.b32.xlu1 %v1971_v32, %s3616_s4 }
 0x603   : > { %1994 = vrot.lane.b32.xlu0 %v1972_v5, %s3616_s4 }
 0x606   : > { %1996 = vrot.lane.b32.xlu1 %v1973_v4, %s3616_s4 }
 0x668   : > { %v1985_v6 = vpop.permute.xlu1 %1984 }
 0x669   : > { %v2007_v0 = vsel %vm1169_vm0, %v1541_v57, %v1985_v6  ;;  %v1983_v3 = vpop.permute.xlu0 %1982 }
 0x66a   : > { %2015 = vst [vmem:[%s4693_s14 + $0x8] sm:$0xff] %v2007_v0  ;;  %v2006_v47 = vsel %vm1169_vm0, %v1540_v36, %v1983_v3 }
 0x66b   : > { %2014 = vst [vmem:[%s4693_s14] sm:$0xff] %v2006_v47 }
 0x66c   : > { %v1989_v14 = vpop.permute.xlu1 %1988 }
 0x66d   : > { %v2009_v25 = vsel %vm1169_vm0, %v1543_v19, %v1989_v14 }
 0x66e   : > { %2017 = vst [vmem:[%s4693_s14 + $0x18] sm:$0xff] %v2009_v25 }
 0x670   : > { %v1987_v43 = vpop.permute.xlu1 %1986 }
 0x671   : > { %v2008_v1 = vsel %vm1169_vm0, %v1542_v52, %v1987_v43  ;;  %v1991_v13 = vpop.permute.xlu0 %1990 }
 0x672   : > { %2016 = vst [vmem:[%s4693_s14 + $0x10] sm:$0xff] %v2008_v1  ;;  %v2010_v26 = vsel %vm1169_vm0, %v1544_v62, %v1991_v13 }
 0x673   : > { %2018 = vst [vmem:[%s4693_s14 + $0x20] sm:$0xff] %v2010_v26 }
 0x674   : > { %v1993_v11 = vpop.permute.xlu1 %1992 }
 0x675   : > { %v2011_v50 = vsel %vm1169_vm0, %v1545_v60, %v1993_v11  ;;  %v1995_v2 = vpop.permute.xlu0 %1994 }
 0x676   : > { %2019 = vst [vmem:[%s4693_s14 + $0x28] sm:$0xff] %v2011_v50  ;;  %v2012_v45 = vsel %vm1169_vm0, %v1546_v63, %v1995_v2 }
 0x677   : > { %2020 = vst [vmem:[%s4693_s14 + $0x30] sm:$0xff] %v2012_v45 }
 0x678   : > { %v1997_v16 = vpop.permute.xlu1 %1996 }
 0x679   : > { %v2013_v46 = vsel %vm1169_vm0, %v1547_v33, %v1997_v16 }
 0x67a   : > { %2021 = vst [vmem:[%s4693_s14 + $0x38] sm:$0xff] %v2013_v46 }
 0x67b   : > { %3465 = shalt.err (!%p3462_p12)
}
 0x67c   : > { %s3466_s9 = scalar_lea.hbm %s4722_s21, 1024  ;;  %s3470_s27 = scalar_lea.hbm %s4879_s1, 6144 }
 0x67d   : > { %p3467_p10 = scmp.ne.s32.totalorder %s4722_s21, %s3466_s9  ;;  %p3471_p8 = scmp.lt.u32.totalorder %s4722_s21, %s4879_s1 }
 0x67e   : > { %p3472_p2 = scmp.lt.u32.totalorder %s3470_s27, %s3466_s9  ;;  %p3474_p13 = scmp.lt.u32.totalorder %s3466_s9, %s4722_s21 }
 0x67f   : > { %p3468_p9 = pnand %p3467_p10, %p4880_p7 }
 0x680   : > { %p3473_p11 = por %p3472_p2, %p3471_p8 }
 0x681   : > { %p3469_p0 = pneg %p3468_p9 }
 0x682   : > { %p3475_p3 = por %p3474_p13, %p3473_p11 }
 0x684   : > { %p3476_p5 = pnand %p3475_p3, %p3469_p0 }
 0x686   : > { %3479 = shalt.err (!%p3476_p5)
}
 0x687   : > { %s3618_s12 = smov 128   ;;  %s3619_s19 = smov 384  }
 0x688   : > { %s3620_s26 = smov 8  }
 0x689   : > { %3087 = dma.vmem_to_hbm [thread:$0]  (%p4880_p7), %s4713_s29, 1024, %s4722_s21, %s4728_s6, %s3618_s12, %s3619_s19, %s3620_s26  }
 0x68a PF: > { %p3107_p6 = scmp.ge.s32.totalorder %s3606_s28, 2  ;;  %s2052_s11 = sand.u32 1, %s3554_s15  }
 0x68b   : > { %p4881_p4 = scmp.ne.s32.totalorder %s4861_s25, 0  ;;  %s2053_s5 = scalar_lea.sflag [#allocation4], %s2052_s11 }
 0x68d   : > { %p3103_p1 = pnand %p3107_p6, %p4881_p4 }
 0x68f   : > { %3549 = dma.done.wait (!%p3103_p1), %s2053_s5, 1024  }
 0x690   : > { %3551 = vsyncadd (!%p3103_p1), %s2053_s5, 4294966272  ;;  %s26_s28 = sadd.s32 1, %s3606_s28   ;;  %s4883_s18 = sld [smem:[#allocation27_spill]] }
 0x691   : > { %p4757_p12 = scmp.ge.s32.totalorder %s26_s28, 8   ;;  %s4884_s29 = sld [smem:[#allocation15_spill]] }
 0x692   : > { %s4885_s21 = sld [smem:[#allocation22_spill]]  ;;  %s4886_s6 = sld [smem:[#allocation16_spill]] }
 0x693   : > { %s4887_s23 = sld [smem:[#allocation26_spill]]  ;;  %s4888_s24 = sld [smem:[#allocation19_spill]] }
 0x694   : > { %s4889_s25 = sld [smem:[#allocation20_spill]]  ;;  %s4890_s26 = sld [smem:[#allocation21_spill]] }
 0x695   : > { %s4891_s27 = sld [smem:[#allocation23_spill]]  ;;  %s4892_s15 = smov %s3558_s16 }
 0x696   : > { %s4893_s16 = smov %s3562_s17  ;;  %s4894_s17 = smov %s4883_s18 }
 0x697   : > { %s4895_s18 = smov %s4884_s29  ;;  %s4896_s19 = smov %s3574_s20 }
 0x698   : > { %s4897_s20 = smov %s4885_s21  ;;  %s4898_s21 = smov %s3582_s22 }
 0x699   : > { %s4899_s22 = smov %s4886_s6  ;;  %25 = sbr.rel (!%p4757_p12) target bundleno = 17 (0x11), region = 118 }
 0x6a0   :  { %2058 = vsyncpa [#allocation3], 1 }
 0x6a1   :  { %2060 = vsyncpa [#allocation3 + $0x1], 1 }
 0x6a2   :  { %2061 = vsyncpa [#allocation6], 1 }
 0x6a3   :  { %2063 = vsyncpa [#allocation6 + $0x1], 1 }
 0x6a4   :  { %2064 = vsyncpa [#allocation9], 1 }
 0x6a5   :  { %2066 = vsyncpa [#allocation9 + $0x1], 1 }
 0x6a6   :  { %2067 = vsyncpa [#allocation4], 1 }
 0x6a7   :  { %2069 = vsyncpa [#allocation4 + $0x1], 1 }

</bundles_post_ra>
